<compile_context>
chip_gen: v7x
topology: tpu7x:2x2x1
jax: 0.10.0
libtpu: 0.0.40
codegen_flags: <defaults>
</compile_context>

<pallas_src>
import functools
import math

import jax
import jax.numpy as jnp
from jax import lax
from jax.experimental import pallas as pl
from jax.experimental.pallas import tpu as pltpu


def _rk4_blockdiag_kernel(dt_ref, z_ref, w1_ref, b1_ref, w2_ref, b2_ref, o_ref,
                          *, n_time, eb, batch, dim, hidden, unroll_threshold):
    """One grid step integrates a fused block of `eb` ensemble members.

    dt_ref : SMEM (T-1,)            f32 step sizes t[i] - t[i-1]
    z_ref  : VMEM (B, eb*D)         initial state tiled across fused members
    w1_ref : VMEM (1, eb*D, eb*H)   block-diagonal fused weights (f32 or bf16)
    b1_ref : VMEM (1, 1,  eb*H)     f32 concatenated biases
    w2_ref : VMEM (1, eb*H, eb*D)
    b2_ref : VMEM (1, 1,  eb*D)
    o_ref  : VMEM (1, T, B*eb*D)    lane-dense trajectory output
    """
    fd = eb * dim          # fused state width
    fh = eb * hidden       # fused hidden width
    lanes = batch * fd

    # ---- hoisted invariant loads / broadcasts (JAX does not CSE these) ----
    w1 = w1_ref[0]                                               # (fd, fh)
    w2 = w2_ref[0]                                               # (fh, fd)
    b1 = jnp.broadcast_to(b1_ref[0].astype(jnp.float32), (batch, fh))
    b2 = jnp.broadcast_to(b2_ref[0].astype(jnp.float32), (batch, fd))
    op_dtype = w1.dtype                                          # f32 default; bf16 opt-in

    def vector_field(zc):
        # zc: (B, fd) f32 -> (B, fd) f32.  One full-width MXU dot per layer,
        # f32 accumulation via preferred_element_type; operands cast once.
        h = jnp.tanh(jnp.dot(zc.astype(op_dtype), w1,
                             preferred_element_type=jnp.float32) + b1)
        return jnp.dot(h.astype(op_dtype), w2,
                       preferred_element_type=jnp.float32) + b2

    def rk4_step(zc, dt):
        half_dt = 0.5 * dt
        k1 = vector_field(zc)
        k2 = vector_field(zc + half_dt * k1)
        k3 = vector_field(zc + half_dt * k2)
        k4 = vector_field(zc + dt * k3)
        return zc + (dt * (1.0 / 6.0)) * (k1 + 2.0 * (k2 + k3) + k4)

    z = z_ref[...].astype(jnp.float32)                           # (B, fd)

    if n_time <= unroll_threshold:
        # Small T: fully unrolled straight-line code; trajectory stacked and
        # stored ONCE -> one sublane->lane relayout + unmasked full-width vst's
        # instead of one relayout + masked partial store per step.
        zs = [z]
        for i in range(1, n_time):
            z = rk4_step(z, dt_ref[i - 1])
            zs.append(z)
        traj = jnp.stack(zs, axis=0)                             # (T, B, fd)
        o_ref[0] = traj.reshape(n_time, lanes).astype(o_ref.dtype)
    else:
        # Large T: bounded unroll keeps vreg pressure in check; per-step store.
        o_ref[0, 0:1, :] = z.reshape(1, lanes).astype(o_ref.dtype)

        def body(i, zc):
            zn = rk4_step(zc, dt_ref[i - 1])
            o_ref[0, pl.ds(i, 1), :] = zn.reshape(1, lanes).astype(o_ref.dtype)
            return zn

        lax.fori_loop(1, n_time, body, z, unroll=4)


def _round_up(x, m):
    return ((x + m - 1) // m) * m


def deep_ensemble_forward(z, t, w1, b1, w2, b2, *, ensemble_block=None,
                          matmul_dtype=jnp.float32, unroll_threshold=32):
    """Pallas implementation of DeepEnsembleModel.forward(z, t, statewise=False).

    z  : [B, D]     initial state (shared by all members)
    t  : [T]        time points
    w1 : [E, D, H]  per-member vector-field MLP weights
    b1 : [E, 1, H]
    w2 : [E, H, D]
    b2 : [E, 1, D]
    returns [E, T, B, D]  (== torch.stack of per-member [T, B, D] trajectories)
    """
    B, D = z.shape
    T = int(t.shape[0])
    E, _, H = w1.shape

    # ---- fused member-block size -------------------------------------------
    # eb members are fused into one block-diagonal matmul; default eb makes
    # eb*H a multiple of 128 (hidden activation fills whole vreg lane rows /
    # one MXU N-tile) while keeping the fused weights small.  On v7x (2 TCs)
    # pass ensemble_block explicitly to get a >=2-step parallel grid.
    if ensemble_block is None:
        m = 128 // math.gcd(H, 128)          # smallest lane-aligned member count
        eb = _round_up(E, m)
        if eb * max(D, H) > 1024:            # cap the fused matmul width
            eb = m
    else:
        eb = int(ensemble_block)
    E_pad = _round_up(E, eb)
    nblk = E_pad // eb

    f32 = jnp.float32
    w1f, b1f, w2f, b2f = (x.astype(f32) for x in (w1, b1, w2, b2))
    pad = E_pad - E
    if pad:  # zero-weight padded members integrate to a constant; dropped below
        w1f = jnp.concatenate([w1f, jnp.zeros((pad, D, H), f32)], axis=0)
        b1f = jnp.concatenate([b1f, jnp.zeros((pad, 1, H), f32)], axis=0)
        w2f = jnp.concatenate([w2f, jnp.zeros((pad, H, D), f32)], axis=0)
        b2f = jnp.concatenate([b2f, jnp.zeros((pad, 1, D), f32)], axis=0)

    # ---- fuse each block of eb members into ONE block-diagonal matmul -------
    eye = jnp.eye(eb, dtype=f32)
    w1_bd = jnp.einsum("gmdh,mn->gmdnh", w1f.reshape(nblk, eb, D, H),
                       eye).reshape(nblk, eb * D, eb * H).astype(matmul_dtype)
    w2_bd = jnp.einsum("gmhd,mn->gmhnd", w2f.reshape(nblk, eb, H, D),
                       eye).reshape(nblk, eb * H, eb * D).astype(matmul_dtype)
    b1_cat = b1f.reshape(nblk, 1, eb * H)
    b2_cat = b2f.reshape(nblk, 1, eb * D)

    # Initial state tiled across the fused members: (B, eb*D).
    z_rep = jnp.tile(z.astype(f32), (1, eb))

    # Step sizes once (one SMEM scalar read per RK4 step in the kernel).
    dt = jnp.diff(t.astype(f32))                                  # (T-1,)

    # ---- VMEM budget guard (v7x: 64 MiB physical / 32 MiB default scoped) ---
    item = jnp.dtype(matmul_dtype).itemsize
    block_bytes = 2 * (                     # double-buffered in/out blocks
        B * eb * D * 4
        + eb * D * eb * H * item + eb * H * eb * D * item
        + eb * H * 4 + eb * D * 4
        + T * B * eb * D * 4)
    vmem_limit = 32 << 20
    # TODO(synk): for production T, add an 'arbitrary' grid axis over T-chunks
    # carrying z in a VMEM scratch accumulator instead of one whole-trajectory
    # output block.
    assert block_bytes < vmem_limit, (
        f"per-step VMEM estimate {block_bytes} B exceeds {vmem_limit} B; "
        "chunk the time axis")

    kernel = functools.partial(
        _rk4_blockdiag_kernel, n_time=T, eb=eb, batch=B, dim=D, hidden=H,
        unroll_threshold=unroll_threshold)

    # Advisory cost estimate (actual MXU work of the fused block-diag matmuls).
    flops = nblk * (T - 1) * 4 * 2 * 2 * (B * (eb * D) * (eb * H))
    transcendentals = nblk * (T - 1) * 4 * B * eb * H
    bytes_accessed = (w1_bd.size * item + w2_bd.size * item
                      + b1_cat.size * 4 + b2_cat.size * 4
                      + z_rep.size * 4 + dt.size * 4
                      + nblk * T * B * eb * D * 4)

    grid_spec = pltpu.PrefetchScalarGridSpec(
        num_scalar_prefetch=0,
        grid=(nblk,),
        in_specs=[
            pl.BlockSpec(memory_space=pltpu.SMEM),                    # dt
            pl.BlockSpec((B, eb * D), lambda g: (0, 0)),              # z (shared)
            pl.BlockSpec((1, eb * D, eb * H), lambda g: (g, 0, 0)),   # W1 block-diag
            pl.BlockSpec((1, 1, eb * H), lambda g: (g, 0, 0)),        # b1
            pl.BlockSpec((1, eb * H, eb * D), lambda g: (g, 0, 0)),   # W2 block-diag
            pl.BlockSpec((1, 1, eb * D), lambda g: (g, 0, 0)),        # b2
        ],
        # Lane-dense output slab: last dim B*eb*D (multiple of 128 for the
        # default eb) -> unmasked full-width stores.
        out_specs=pl.BlockSpec((1, T, B * eb * D), lambda g: (g, 0, 0)),
    )

    out = pl.pallas_call(
        kernel,
        out_shape=jax.ShapeDtypeStruct((nblk, T, B * eb * D), jnp.float32),
        grid_spec=grid_spec,
        compiler_params=pltpu.CompilerParams(
            dimension_semantics=("parallel",),
            vmem_limit_bytes=vmem_limit),
        cost_estimate=pl.CostEstimate(
            flops=flops,
            transcendentals=transcendentals,
            bytes_accessed=bytes_accessed),
    )(dt, z_rep, w1_bd, b1_cat, w2_bd, b2_cat)

    # Kernel layout (nblk, T, B*eb*D) -> module layout (E, T, B, D).
    out = out.reshape(nblk, T, B, eb, D).transpose(0, 3, 1, 2, 4)
    return out.reshape(E_pad, T, B, D)[:E]


def _reference_forward(z, t, w1, b1, w2, b2):
    """Pure-JAX reference (mirrors per-member torch integrate + stack), f32."""

    def vector_field(zc, W1, B1, W2, B2):
        return jnp.tanh(zc @ W1 + B1) @ W2 + B2

    def integrate_one(W1, B1, W2, B2):
        def step(zc, i):
            dt = t[i] - t[i - 1]
            k1 = vector_field(zc, W1, B1, W2, B2)
            k2 = vector_field(zc + 0.5 * dt * k1, W1, B1, W2, B2)
            k3 = vector_field(zc + 0.5 * dt * k2, W1, B1, W2, B2)
            k4 = vector_field(zc + dt * k3, W1, B1, W2, B2)
            zn = zc + (dt / 6.0) * (k1 + 2.0 * k2 + 2.0 * k3 + k4)
            return zn, zn

        _, traj = jax.lax.scan(step, z, jnp.arange(1, t.shape[0]))
        return jnp.concatenate([z[None], traj], axis=0)

    return jax.vmap(integrate_one)(w1, b1, w2, b2)


if __name__ == "__main__":
    # Small deterministic shapes.  H=32 -> the default fused block pads E=3 to
    # eb=4 members, so the fused hidden activation is exactly (8, 128) and the
    # trajectory slab is (T, 512) lane-dense.
    E = 3    # ensemble size
    B = 8    # batch
    D = 16   # state dim
    H = 32   # hidden dim of each member's vector-field MLP
    T = 8    # number of time points

    key = jax.random.PRNGKey(0)
    k_z, k_w1, k_b1, k_w2, k_b2 = jax.random.split(key, 5)

    z = jax.random.normal(k_z, (B, D), dtype=jnp.float32)
    t = jnp.linspace(0.0, 0.7, T, dtype=jnp.float32)

    w1 = 0.1 * jax.random.normal(k_w1, (E, D, H), dtype=jnp.float32)
    b1 = 0.1 * jax.random.normal(k_b1, (E, 1, H), dtype=jnp.float32)
    w2 = 0.1 * jax.random.normal(k_w2, (E, H, D), dtype=jnp.float32)
    b2 = 0.1 * jax.random.normal(k_b2, (E, 1, D), dtype=jnp.float32)

    ref = _reference_forward(z, t, w1, b1, w2, b2)

    # Default (f32 matmul operands, all members fused into one block).
    out = deep_ensemble_forward(z, t, w1, b1, w2, b2)
    out = jax.block_until_ready(out)
    assert out.shape == (E, T, B, D), out.shape
    assert jnp.allclose(out, ref, atol=1e-4, rtol=1e-4), "mismatch vs reference"

    # Multi-block grid (eb=2 -> 2 parallel grid steps, the v7x 2-TensorCore
    # configuration); still f32 operands.
    out_mb = deep_ensemble_forward(z, t, w1, b1, w2, b2, ensemble_block=2)
    out_mb = jax.block_until_ready(out_mb)
    assert out_mb.shape == (E, T, B, D), out_mb.shape
    assert jnp.allclose(out_mb, ref, atol=1e-4, rtol=1e-4), "multi-block mismatch"

    # bf16 matmul-operand path (v6e/v7x MXU fast path); RK4 state stays f32 so
    # only the per-step vector-field evaluation carries bf16 rounding.
    out_bf16 = deep_ensemble_forward(z, t, w1, b1, w2, b2,
                                     matmul_dtype=jnp.bfloat16)
    out_bf16 = jax.block_until_ready(out_bf16)
    assert out_bf16.shape == (E, T, B, D), out_bf16.shape
    assert jnp.allclose(out_bf16, ref, atol=5e-2, rtol=5e-2), "bf16 path diverged"

    print("KERNEL_OK")
</pallas_src>

<mosaic_0001>
module attributes {stable_mosaic.version = 11 : i64} {
  func.func @_rk4_blockdiag_kernel(%arg0: i32, %arg1: memref<7xf32, #tpu.memory_space<smem>>, %arg2: memref<8x64xf32, #tpu.memory_space<vmem>>, %arg3: memref<1x64x128xf32, #tpu.memory_space<vmem>>, %arg4: memref<1x1x128xf32, #tpu.memory_space<vmem>>, %arg5: memref<1x128x64xf32, #tpu.memory_space<vmem>>, %arg6: memref<1x1x64xf32, #tpu.memory_space<vmem>>, %arg7: memref<1x8x512xf32, #tpu.memory_space<vmem>>) attributes {dimension_semantics = [#tpu.dimension_semantics<parallel>], iteration_bounds = array<i64: 1>, scalar_prefetch = 0 : i64, scratch_operands = 0 : i64, tpu.core_type = #tpu.core_type<tc>, window_params = [{transform_indices = @transform_0, window_bounds = array<i64: 7>}, {pipeline_mode = #tpu.pipeline_mode<synchronous>, transform_indices = @transform_1, window_bounds = array<i64: 8, 64>}, {transform_indices = @transform_2, window_bounds = array<i64: 1, 64, 128>}, {transform_indices = @transform_3, window_bounds = array<i64: 1, 1, 128>}, {transform_indices = @transform_4, window_bounds = array<i64: 1, 128, 64>}, {transform_indices = @transform_5, window_bounds = array<i64: 1, 1, 64>}, {transform_indices = @transform_6, window_bounds = array<i64: 1, 8, 512>}]} {
    %c0 = arith.constant 0 : index
    %c0_0 = arith.constant 0 : index
    %c0_1 = arith.constant 0 : index
    %0 = vector.load %arg3[%c0, %c0_0, %c0_1] : memref<1x64x128xf32, #tpu.memory_space<vmem>>, vector<1x64x128xf32>
    %1 = vector.shape_cast %0 : vector<1x64x128xf32> to vector<64x128xf32>
    %c0_2 = arith.constant 0 : index
    %c0_3 = arith.constant 0 : index
    %c0_4 = arith.constant 0 : index
    %2 = vector.load %arg5[%c0_2, %c0_3, %c0_4] : memref<1x128x64xf32, #tpu.memory_space<vmem>>, vector<1x128x64xf32>
    %3 = vector.shape_cast %2 : vector<1x128x64xf32> to vector<128x64xf32>
    %c0_5 = arith.constant 0 : index
    %c0_6 = arith.constant 0 : index
    %c0_7 = arith.constant 0 : index
    %4 = vector.load %arg4[%c0_5, %c0_6, %c0_7] : memref<1x1x128xf32, #tpu.memory_space<vmem>>, vector<1x1x128xf32>
    %5 = vector.shape_cast %4 : vector<1x1x128xf32> to vector<1x128xf32>
    %6 = vector.shape_cast %5 : vector<1x128xf32> to vector<1x128xf32>
    %7 = vector.broadcast %6 : vector<1x128xf32> to vector<8x128xf32>
    %c0_8 = arith.constant 0 : index
    %c0_9 = arith.constant 0 : index
    %c0_10 = arith.constant 0 : index
    %8 = vector.load %arg6[%c0_8, %c0_9, %c0_10] : memref<1x1x64xf32, #tpu.memory_space<vmem>>, vector<1x1x64xf32>
    %9 = vector.shape_cast %8 : vector<1x1x64xf32> to vector<1x64xf32>
    %10 = vector.shape_cast %9 : vector<1x64xf32> to vector<1x64xf32>
    %11 = vector.broadcast %10 : vector<1x64xf32> to vector<8x64xf32>
    %c0_11 = arith.constant 0 : index
    %c0_12 = arith.constant 0 : index
    %12 = vector.load %arg2[%c0_11, %c0_12] : memref<8x64xf32, #tpu.memory_space<vmem>>, vector<8x64xf32>
    %c0_13 = arith.constant 0 : index
    %13 = memref.load %arg1[%c0_13] : memref<7xf32, #tpu.memory_space<smem>>
    %cst = arith.constant 5.000000e-01 : f32
    %14 = arith.mulf %cst, %13 : f32
    %cst_14 = arith.constant dense<0.000000e+00> : vector<8x128xf32>
    %15 = tpu.matmul %12, %1, %cst_14 {dimension_numbers = #tpu.dot_dimension_numbers<[1], [0], [0], [1], [0, 0, 1, 1], [], []>} : vector<8x64xf32>, vector<64x128xf32>, vector<8x128xf32> -> vector<8x128xf32>
    %16 = arith.addf %15, %7 : vector<8x128xf32>
    %17 = math.tanh %16 : vector<8x128xf32>
    %cst_15 = arith.constant dense<0.000000e+00> : vector<8x64xf32>
    %18 = tpu.matmul %17, %3, %cst_15 {dimension_numbers = #tpu.dot_dimension_numbers<[1], [0], [0], [1], [0, 0, 1, 1], [], []>} : vector<8x128xf32>, vector<128x64xf32>, vector<8x64xf32> -> vector<8x64xf32>
    %19 = arith.addf %18, %11 : vector<8x64xf32>
    %20 = vector.broadcast %14 : f32 to vector<8x64xf32>
    %21 = arith.mulf %20, %19 : vector<8x64xf32>
    %22 = arith.addf %12, %21 : vector<8x64xf32>
    %cst_16 = arith.constant dense<0.000000e+00> : vector<8x128xf32>
    %23 = tpu.matmul %22, %1, %cst_16 {dimension_numbers = #tpu.dot_dimension_numbers<[1], [0], [0], [1], [0, 0, 1, 1], [], []>} : vector<8x64xf32>, vector<64x128xf32>, vector<8x128xf32> -> vector<8x128xf32>
    %24 = arith.addf %23, %7 : vector<8x128xf32>
    %25 = math.tanh %24 : vector<8x128xf32>
    %cst_17 = arith.constant dense<0.000000e+00> : vector<8x64xf32>
    %26 = tpu.matmul %25, %3, %cst_17 {dimension_numbers = #tpu.dot_dimension_numbers<[1], [0], [0], [1], [0, 0, 1, 1], [], []>} : vector<8x128xf32>, vector<128x64xf32>, vector<8x64xf32> -> vector<8x64xf32>
    %27 = arith.addf %26, %11 : vector<8x64xf32>
    %28 = vector.broadcast %14 : f32 to vector<8x64xf32>
    %29 = arith.mulf %28, %27 : vector<8x64xf32>
    %30 = arith.addf %12, %29 : vector<8x64xf32>
    %cst_18 = arith.constant dense<0.000000e+00> : vector<8x128xf32>
    %31 = tpu.matmul %30, %1, %cst_18 {dimension_numbers = #tpu.dot_dimension_numbers<[1], [0], [0], [1], [0, 0, 1, 1], [], []>} : vector<8x64xf32>, vector<64x128xf32>, vector<8x128xf32> -> vector<8x128xf32>
    %32 = arith.addf %31, %7 : vector<8x128xf32>
    %33 = math.tanh %32 : vector<8x128xf32>
    %cst_19 = arith.constant dense<0.000000e+00> : vector<8x64xf32>
    %34 = tpu.matmul %33, %3, %cst_19 {dimension_numbers = #tpu.dot_dimension_numbers<[1], [0], [0], [1], [0, 0, 1, 1], [], []>} : vector<8x128xf32>, vector<128x64xf32>, vector<8x64xf32> -> vector<8x64xf32>
    %35 = arith.addf %34, %11 : vector<8x64xf32>
    %36 = vector.broadcast %13 : f32 to vector<8x64xf32>
    %37 = arith.mulf %36, %35 : vector<8x64xf32>
    %38 = arith.addf %12, %37 : vector<8x64xf32>
    %cst_20 = arith.constant dense<0.000000e+00> : vector<8x128xf32>
    %39 = tpu.matmul %38, %1, %cst_20 {dimension_numbers = #tpu.dot_dimension_numbers<[1], [0], [0], [1], [0, 0, 1, 1], [], []>} : vector<8x64xf32>, vector<64x128xf32>, vector<8x128xf32> -> vector<8x128xf32>
    %40 = arith.addf %39, %7 : vector<8x128xf32>
    %41 = math.tanh %40 : vector<8x128xf32>
    %cst_21 = arith.constant dense<0.000000e+00> : vector<8x64xf32>
    %42 = tpu.matmul %41, %3, %cst_21 {dimension_numbers = #tpu.dot_dimension_numbers<[1], [0], [0], [1], [0, 0, 1, 1], [], []>} : vector<8x128xf32>, vector<128x64xf32>, vector<8x64xf32> -> vector<8x64xf32>
    %43 = arith.addf %42, %11 : vector<8x64xf32>
    %cst_22 = arith.constant 0.166666672 : f32
    %44 = arith.mulf %13, %cst_22 : f32
    %45 = arith.addf %27, %35 : vector<8x64xf32>
    %cst_23 = arith.constant 2.000000e+00 : f32
    %46 = vector.broadcast %cst_23 : f32 to vector<8x64xf32>
    %47 = arith.mulf %46, %45 : vector<8x64xf32>
    %48 = arith.addf %19, %47 : vector<8x64xf32>
    %49 = arith.addf %48, %43 : vector<8x64xf32>
    %50 = vector.broadcast %44 : f32 to vector<8x64xf32>
    %51 = arith.mulf %50, %49 : vector<8x64xf32>
    %52 = arith.addf %12, %51 : vector<8x64xf32>
    %c1 = arith.constant 1 : index
    %53 = memref.load %arg1[%c1] : memref<7xf32, #tpu.memory_space<smem>>
    %cst_24 = arith.constant 5.000000e-01 : f32
    %54 = arith.mulf %cst_24, %53 : f32
    %cst_25 = arith.constant dense<0.000000e+00> : vector<8x128xf32>
    %55 = tpu.matmul %52, %1, %cst_25 {dimension_numbers = #tpu.dot_dimension_numbers<[1], [0], [0], [1], [0, 0, 1, 1], [], []>} : vector<8x64xf32>, vector<64x128xf32>, vector<8x128xf32> -> vector<8x128xf32>
    %56 = arith.addf %55, %7 : vector<8x128xf32>
    %57 = math.tanh %56 : vector<8x128xf32>
    %cst_26 = arith.constant dense<0.000000e+00> : vector<8x64xf32>
    %58 = tpu.matmul %57, %3, %cst_26 {dimension_numbers = #tpu.dot_dimension_numbers<[1], [0], [0], [1], [0, 0, 1, 1], [], []>} : vector<8x128xf32>, vector<128x64xf32>, vector<8x64xf32> -> vector<8x64xf32>
    %59 = arith.addf %58, %11 : vector<8x64xf32>
    %60 = vector.broadcast %54 : f32 to vector<8x64xf32>
    %61 = arith.mulf %60, %59 : vector<8x64xf32>
    %62 = arith.addf %52, %61 : vector<8x64xf32>
    %cst_27 = arith.constant dense<0.000000e+00> : vector<8x128xf32>
    %63 = tpu.matmul %62, %1, %cst_27 {dimension_numbers = #tpu.dot_dimension_numbers<[1], [0], [0], [1], [0, 0, 1, 1], [], []>} : vector<8x64xf32>, vector<64x128xf32>, vector<8x128xf32> -> vector<8x128xf32>
    %64 = arith.addf %63, %7 : vector<8x128xf32>
    %65 = math.tanh %64 : vector<8x128xf32>
    %cst_28 = arith.constant dense<0.000000e+00> : vector<8x64xf32>
    %66 = tpu.matmul %65, %3, %cst_28 {dimension_numbers = #tpu.dot_dimension_numbers<[1], [0], [0], [1], [0, 0, 1, 1], [], []>} : vector<8x128xf32>, vector<128x64xf32>, vector<8x64xf32> -> vector<8x64xf32>
    %67 = arith.addf %66, %11 : vector<8x64xf32>
    %68 = vector.broadcast %54 : f32 to vector<8x64xf32>
    %69 = arith.mulf %68, %67 : vector<8x64xf32>
    %70 = arith.addf %52, %69 : vector<8x64xf32>
    %cst_29 = arith.constant dense<0.000000e+00> : vector<8x128xf32>
    %71 = tpu.matmul %70, %1, %cst_29 {dimension_numbers = #tpu.dot_dimension_numbers<[1], [0], [0], [1], [0, 0, 1, 1], [], []>} : vector<8x64xf32>, vector<64x128xf32>, vector<8x128xf32> -> vector<8x128xf32>
    %72 = arith.addf %71, %7 : vector<8x128xf32>
    %73 = math.tanh %72 : vector<8x128xf32>
    %cst_30 = arith.constant dense<0.000000e+00> : vector<8x64xf32>
    %74 = tpu.matmul %73, %3, %cst_30 {dimension_numbers = #tpu.dot_dimension_numbers<[1], [0], [0], [1], [0, 0, 1, 1], [], []>} : vector<8x128xf32>, vector<128x64xf32>, vector<8x64xf32> -> vector<8x64xf32>
    %75 = arith.addf %74, %11 : vector<8x64xf32>
    %76 = vector.broadcast %53 : f32 to vector<8x64xf32>
    %77 = arith.mulf %76, %75 : vector<8x64xf32>
    %78 = arith.addf %52, %77 : vector<8x64xf32>
    %cst_31 = arith.constant dense<0.000000e+00> : vector<8x128xf32>
    %79 = tpu.matmul %78, %1, %cst_31 {dimension_numbers = #tpu.dot_dimension_numbers<[1], [0], [0], [1], [0, 0, 1, 1], [], []>} : vector<8x64xf32>, vector<64x128xf32>, vector<8x128xf32> -> vector<8x128xf32>
    %80 = arith.addf %79, %7 : vector<8x128xf32>
    %81 = math.tanh %80 : vector<8x128xf32>
    %cst_32 = arith.constant dense<0.000000e+00> : vector<8x64xf32>
    %82 = tpu.matmul %81, %3, %cst_32 {dimension_numbers = #tpu.dot_dimension_numbers<[1], [0], [0], [1], [0, 0, 1, 1], [], []>} : vector<8x128xf32>, vector<128x64xf32>, vector<8x64xf32> -> vector<8x64xf32>
    %83 = arith.addf %82, %11 : vector<8x64xf32>
    %cst_33 = arith.constant 0.166666672 : f32
    %84 = arith.mulf %53, %cst_33 : f32
    %85 = arith.addf %67, %75 : vector<8x64xf32>
    %cst_34 = arith.constant 2.000000e+00 : f32
    %86 = vector.broadcast %cst_34 : f32 to vector<8x64xf32>
    %87 = arith.mulf %86, %85 : vector<8x64xf32>
    %88 = arith.addf %59, %87 : vector<8x64xf32>
    %89 = arith.addf %88, %83 : vector<8x64xf32>
    %90 = vector.broadcast %84 : f32 to vector<8x64xf32>
    %91 = arith.mulf %90, %89 : vector<8x64xf32>
    %92 = arith.addf %52, %91 : vector<8x64xf32>
    %c2 = arith.constant 2 : index
    %93 = memref.load %arg1[%c2] : memref<7xf32, #tpu.memory_space<smem>>
    %cst_35 = arith.constant 5.000000e-01 : f32
    %94 = arith.mulf %cst_35, %93 : f32
    %cst_36 = arith.constant dense<0.000000e+00> : vector<8x128xf32>
    %95 = tpu.matmul %92, %1, %cst_36 {dimension_numbers = #tpu.dot_dimension_numbers<[1], [0], [0], [1], [0, 0, 1, 1], [], []>} : vector<8x64xf32>, vector<64x128xf32>, vector<8x128xf32> -> vector<8x128xf32>
    %96 = arith.addf %95, %7 : vector<8x128xf32>
    %97 = math.tanh %96 : vector<8x128xf32>
    %cst_37 = arith.constant dense<0.000000e+00> : vector<8x64xf32>
    %98 = tpu.matmul %97, %3, %cst_37 {dimension_numbers = #tpu.dot_dimension_numbers<[1], [0], [0], [1], [0, 0, 1, 1], [], []>} : vector<8x128xf32>, vector<128x64xf32>, vector<8x64xf32> -> vector<8x64xf32>
    %99 = arith.addf %98, %11 : vector<8x64xf32>
    %100 = vector.broadcast %94 : f32 to vector<8x64xf32>
    %101 = arith.mulf %100, %99 : vector<8x64xf32>
    %102 = arith.addf %92, %101 : vector<8x64xf32>
    %cst_38 = arith.constant dense<0.000000e+00> : vector<8x128xf32>
    %103 = tpu.matmul %102, %1, %cst_38 {dimension_numbers = #tpu.dot_dimension_numbers<[1], [0], [0], [1], [0, 0, 1, 1], [], []>} : vector<8x64xf32>, vector<64x128xf32>, vector<8x128xf32> -> vector<8x128xf32>
    %104 = arith.addf %103, %7 : vector<8x128xf32>
    %105 = math.tanh %104 : vector<8x128xf32>
    %cst_39 = arith.constant dense<0.000000e+00> : vector<8x64xf32>
    %106 = tpu.matmul %105, %3, %cst_39 {dimension_numbers = #tpu.dot_dimension_numbers<[1], [0], [0], [1], [0, 0, 1, 1], [], []>} : vector<8x128xf32>, vector<128x64xf32>, vector<8x64xf32> -> vector<8x64xf32>
    %107 = arith.addf %106, %11 : vector<8x64xf32>
    %108 = vector.broadcast %94 : f32 to vector<8x64xf32>
    %109 = arith.mulf %108, %107 : vector<8x64xf32>
    %110 = arith.addf %92, %109 : vector<8x64xf32>
    %cst_40 = arith.constant dense<0.000000e+00> : vector<8x128xf32>
    %111 = tpu.matmul %110, %1, %cst_40 {dimension_numbers = #tpu.dot_dimension_numbers<[1], [0], [0], [1], [0, 0, 1, 1], [], []>} : vector<8x64xf32>, vector<64x128xf32>, vector<8x128xf32> -> vector<8x128xf32>
    %112 = arith.addf %111, %7 : vector<8x128xf32>
    %113 = math.tanh %112 : vector<8x128xf32>
    %cst_41 = arith.constant dense<0.000000e+00> : vector<8x64xf32>
    %114 = tpu.matmul %113, %3, %cst_41 {dimension_numbers = #tpu.dot_dimension_numbers<[1], [0], [0], [1], [0, 0, 1, 1], [], []>} : vector<8x128xf32>, vector<128x64xf32>, vector<8x64xf32> -> vector<8x64xf32>
    %115 = arith.addf %114, %11 : vector<8x64xf32>
    %116 = vector.broadcast %93 : f32 to vector<8x64xf32>
    %117 = arith.mulf %116, %115 : vector<8x64xf32>
    %118 = arith.addf %92, %117 : vector<8x64xf32>
    %cst_42 = arith.constant dense<0.000000e+00> : vector<8x128xf32>
    %119 = tpu.matmul %118, %1, %cst_42 {dimension_numbers = #tpu.dot_dimension_numbers<[1], [0], [0], [1], [0, 0, 1, 1], [], []>} : vector<8x64xf32>, vector<64x128xf32>, vector<8x128xf32> -> vector<8x128xf32>
    %120 = arith.addf %119, %7 : vector<8x128xf32>
    %121 = math.tanh %120 : vector<8x128xf32>
    %cst_43 = arith.constant dense<0.000000e+00> : vector<8x64xf32>
    %122 = tpu.matmul %121, %3, %cst_43 {dimension_numbers = #tpu.dot_dimension_numbers<[1], [0], [0], [1], [0, 0, 1, 1], [], []>} : vector<8x128xf32>, vector<128x64xf32>, vector<8x64xf32> -> vector<8x64xf32>
    %123 = arith.addf %122, %11 : vector<8x64xf32>
    %cst_44 = arith.constant 0.166666672 : f32
    %124 = arith.mulf %93, %cst_44 : f32
    %125 = arith.addf %107, %115 : vector<8x64xf32>
    %cst_45 = arith.constant 2.000000e+00 : f32
    %126 = vector.broadcast %cst_45 : f32 to vector<8x64xf32>
    %127 = arith.mulf %126, %125 : vector<8x64xf32>
    %128 = arith.addf %99, %127 : vector<8x64xf32>
    %129 = arith.addf %128, %123 : vector<8x64xf32>
    %130 = vector.broadcast %124 : f32 to vector<8x64xf32>
    %131 = arith.mulf %130, %129 : vector<8x64xf32>
    %132 = arith.addf %92, %131 : vector<8x64xf32>
    %c3 = arith.constant 3 : index
    %133 = memref.load %arg1[%c3] : memref<7xf32, #tpu.memory_space<smem>>
    %cst_46 = arith.constant 5.000000e-01 : f32
    %134 = arith.mulf %cst_46, %133 : f32
    %cst_47 = arith.constant dense<0.000000e+00> : vector<8x128xf32>
    %135 = tpu.matmul %132, %1, %cst_47 {dimension_numbers = #tpu.dot_dimension_numbers<[1], [0], [0], [1], [0, 0, 1, 1], [], []>} : vector<8x64xf32>, vector<64x128xf32>, vector<8x128xf32> -> vector<8x128xf32>
    %136 = arith.addf %135, %7 : vector<8x128xf32>
    %137 = math.tanh %136 : vector<8x128xf32>
    %cst_48 = arith.constant dense<0.000000e+00> : vector<8x64xf32>
    %138 = tpu.matmul %137, %3, %cst_48 {dimension_numbers = #tpu.dot_dimension_numbers<[1], [0], [0], [1], [0, 0, 1, 1], [], []>} : vector<8x128xf32>, vector<128x64xf32>, vector<8x64xf32> -> vector<8x64xf32>
    %139 = arith.addf %138, %11 : vector<8x64xf32>
    %140 = vector.broadcast %134 : f32 to vector<8x64xf32>
    %141 = arith.mulf %140, %139 : vector<8x64xf32>
    %142 = arith.addf %132, %141 : vector<8x64xf32>
    %cst_49 = arith.constant dense<0.000000e+00> : vector<8x128xf32>
    %143 = tpu.matmul %142, %1, %cst_49 {dimension_numbers = #tpu.dot_dimension_numbers<[1], [0], [0], [1], [0, 0, 1, 1], [], []>} : vector<8x64xf32>, vector<64x128xf32>, vector<8x128xf32> -> vector<8x128xf32>
    %144 = arith.addf %143, %7 : vector<8x128xf32>
    %145 = math.tanh %144 : vector<8x128xf32>
    %cst_50 = arith.constant dense<0.000000e+00> : vector<8x64xf32>
    %146 = tpu.matmul %145, %3, %cst_50 {dimension_numbers = #tpu.dot_dimension_numbers<[1], [0], [0], [1], [0, 0, 1, 1], [], []>} : vector<8x128xf32>, vector<128x64xf32>, vector<8x64xf32> -> vector<8x64xf32>
    %147 = arith.addf %146, %11 : vector<8x64xf32>
    %148 = vector.broadcast %134 : f32 to vector<8x64xf32>
    %149 = arith.mulf %148, %147 : vector<8x64xf32>
    %150 = arith.addf %132, %149 : vector<8x64xf32>
    %cst_51 = arith.constant dense<0.000000e+00> : vector<8x128xf32>
    %151 = tpu.matmul %150, %1, %cst_51 {dimension_numbers = #tpu.dot_dimension_numbers<[1], [0], [0], [1], [0, 0, 1, 1], [], []>} : vector<8x64xf32>, vector<64x128xf32>, vector<8x128xf32> -> vector<8x128xf32>
    %152 = arith.addf %151, %7 : vector<8x128xf32>
    %153 = math.tanh %152 : vector<8x128xf32>
    %cst_52 = arith.constant dense<0.000000e+00> : vector<8x64xf32>
    %154 = tpu.matmul %153, %3, %cst_52 {dimension_numbers = #tpu.dot_dimension_numbers<[1], [0], [0], [1], [0, 0, 1, 1], [], []>} : vector<8x128xf32>, vector<128x64xf32>, vector<8x64xf32> -> vector<8x64xf32>
    %155 = arith.addf %154, %11 : vector<8x64xf32>
    %156 = vector.broadcast %133 : f32 to vector<8x64xf32>
    %157 = arith.mulf %156, %155 : vector<8x64xf32>
    %158 = arith.addf %132, %157 : vector<8x64xf32>
    %cst_53 = arith.constant dense<0.000000e+00> : vector<8x128xf32>
    %159 = tpu.matmul %158, %1, %cst_53 {dimension_numbers = #tpu.dot_dimension_numbers<[1], [0], [0], [1], [0, 0, 1, 1], [], []>} : vector<8x64xf32>, vector<64x128xf32>, vector<8x128xf32> -> vector<8x128xf32>
    %160 = arith.addf %159, %7 : vector<8x128xf32>
    %161 = math.tanh %160 : vector<8x128xf32>
    %cst_54 = arith.constant dense<0.000000e+00> : vector<8x64xf32>
    %162 = tpu.matmul %161, %3, %cst_54 {dimension_numbers = #tpu.dot_dimension_numbers<[1], [0], [0], [1], [0, 0, 1, 1], [], []>} : vector<8x128xf32>, vector<128x64xf32>, vector<8x64xf32> -> vector<8x64xf32>
    %163 = arith.addf %162, %11 : vector<8x64xf32>
    %cst_55 = arith.constant 0.166666672 : f32
    %164 = arith.mulf %133, %cst_55 : f32
    %165 = arith.addf %147, %155 : vector<8x64xf32>
    %cst_56 = arith.constant 2.000000e+00 : f32
    %166 = vector.broadcast %cst_56 : f32 to vector<8x64xf32>
    %167 = arith.mulf %166, %165 : vector<8x64xf32>
    %168 = arith.addf %139, %167 : vector<8x64xf32>
    %169 = arith.addf %168, %163 : vector<8x64xf32>
    %170 = vector.broadcast %164 : f32 to vector<8x64xf32>
    %171 = arith.mulf %170, %169 : vector<8x64xf32>
    %172 = arith.addf %132, %171 : vector<8x64xf32>
    %c4 = arith.constant 4 : index
    %173 = memref.load %arg1[%c4] : memref<7xf32, #tpu.memory_space<smem>>
    %cst_57 = arith.constant 5.000000e-01 : f32
    %174 = arith.mulf %cst_57, %173 : f32
    %cst_58 = arith.constant dense<0.000000e+00> : vector<8x128xf32>
    %175 = tpu.matmul %172, %1, %cst_58 {dimension_numbers = #tpu.dot_dimension_numbers<[1], [0], [0], [1], [0, 0, 1, 1], [], []>} : vector<8x64xf32>, vector<64x128xf32>, vector<8x128xf32> -> vector<8x128xf32>
    %176 = arith.addf %175, %7 : vector<8x128xf32>
    %177 = math.tanh %176 : vector<8x128xf32>
    %cst_59 = arith.constant dense<0.000000e+00> : vector<8x64xf32>
    %178 = tpu.matmul %177, %3, %cst_59 {dimension_numbers = #tpu.dot_dimension_numbers<[1], [0], [0], [1], [0, 0, 1, 1], [], []>} : vector<8x128xf32>, vector<128x64xf32>, vector<8x64xf32> -> vector<8x64xf32>
    %179 = arith.addf %178, %11 : vector<8x64xf32>
    %180 = vector.broadcast %174 : f32 to vector<8x64xf32>
    %181 = arith.mulf %180, %179 : vector<8x64xf32>
    %182 = arith.addf %172, %181 : vector<8x64xf32>
    %cst_60 = arith.constant dense<0.000000e+00> : vector<8x128xf32>
    %183 = tpu.matmul %182, %1, %cst_60 {dimension_numbers = #tpu.dot_dimension_numbers<[1], [0], [0], [1], [0, 0, 1, 1], [], []>} : vector<8x64xf32>, vector<64x128xf32>, vector<8x128xf32> -> vector<8x128xf32>
    %184 = arith.addf %183, %7 : vector<8x128xf32>
    %185 = math.tanh %184 : vector<8x128xf32>
    %cst_61 = arith.constant dense<0.000000e+00> : vector<8x64xf32>
    %186 = tpu.matmul %185, %3, %cst_61 {dimension_numbers = #tpu.dot_dimension_numbers<[1], [0], [0], [1], [0, 0, 1, 1], [], []>} : vector<8x128xf32>, vector<128x64xf32>, vector<8x64xf32> -> vector<8x64xf32>
    %187 = arith.addf %186, %11 : vector<8x64xf32>
    %188 = vector.broadcast %174 : f32 to vector<8x64xf32>
    %189 = arith.mulf %188, %187 : vector<8x64xf32>
    %190 = arith.addf %172, %189 : vector<8x64xf32>
    %cst_62 = arith.constant dense<0.000000e+00> : vector<8x128xf32>
    %191 = tpu.matmul %190, %1, %cst_62 {dimension_numbers = #tpu.dot_dimension_numbers<[1], [0], [0], [1], [0, 0, 1, 1], [], []>} : vector<8x64xf32>, vector<64x128xf32>, vector<8x128xf32> -> vector<8x128xf32>
    %192 = arith.addf %191, %7 : vector<8x128xf32>
    %193 = math.tanh %192 : vector<8x128xf32>
    %cst_63 = arith.constant dense<0.000000e+00> : vector<8x64xf32>
    %194 = tpu.matmul %193, %3, %cst_63 {dimension_numbers = #tpu.dot_dimension_numbers<[1], [0], [0], [1], [0, 0, 1, 1], [], []>} : vector<8x128xf32>, vector<128x64xf32>, vector<8x64xf32> -> vector<8x64xf32>
    %195 = arith.addf %194, %11 : vector<8x64xf32>
    %196 = vector.broadcast %173 : f32 to vector<8x64xf32>
    %197 = arith.mulf %196, %195 : vector<8x64xf32>
    %198 = arith.addf %172, %197 : vector<8x64xf32>
    %cst_64 = arith.constant dense<0.000000e+00> : vector<8x128xf32>
    %199 = tpu.matmul %198, %1, %cst_64 {dimension_numbers = #tpu.dot_dimension_numbers<[1], [0], [0], [1], [0, 0, 1, 1], [], []>} : vector<8x64xf32>, vector<64x128xf32>, vector<8x128xf32> -> vector<8x128xf32>
    %200 = arith.addf %199, %7 : vector<8x128xf32>
    %201 = math.tanh %200 : vector<8x128xf32>
    %cst_65 = arith.constant dense<0.000000e+00> : vector<8x64xf32>
    %202 = tpu.matmul %201, %3, %cst_65 {dimension_numbers = #tpu.dot_dimension_numbers<[1], [0], [0], [1], [0, 0, 1, 1], [], []>} : vector<8x128xf32>, vector<128x64xf32>, vector<8x64xf32> -> vector<8x64xf32>
    %203 = arith.addf %202, %11 : vector<8x64xf32>
    %cst_66 = arith.constant 0.166666672 : f32
    %204 = arith.mulf %173, %cst_66 : f32
    %205 = arith.addf %187, %195 : vector<8x64xf32>
    %cst_67 = arith.constant 2.000000e+00 : f32
    %206 = vector.broadcast %cst_67 : f32 to vector<8x64xf32>
    %207 = arith.mulf %206, %205 : vector<8x64xf32>
    %208 = arith.addf %179, %207 : vector<8x64xf32>
    %209 = arith.addf %208, %203 : vector<8x64xf32>
    %210 = vector.broadcast %204 : f32 to vector<8x64xf32>
    %211 = arith.mulf %210, %209 : vector<8x64xf32>
    %212 = arith.addf %172, %211 : vector<8x64xf32>
    %c5 = arith.constant 5 : index
    %213 = memref.load %arg1[%c5] : memref<7xf32, #tpu.memory_space<smem>>
    %cst_68 = arith.constant 5.000000e-01 : f32
    %214 = arith.mulf %cst_68, %213 : f32
    %cst_69 = arith.constant dense<0.000000e+00> : vector<8x128xf32>
    %215 = tpu.matmul %212, %1, %cst_69 {dimension_numbers = #tpu.dot_dimension_numbers<[1], [0], [0], [1], [0, 0, 1, 1], [], []>} : vector<8x64xf32>, vector<64x128xf32>, vector<8x128xf32> -> vector<8x128xf32>
    %216 = arith.addf %215, %7 : vector<8x128xf32>
    %217 = math.tanh %216 : vector<8x128xf32>
    %cst_70 = arith.constant dense<0.000000e+00> : vector<8x64xf32>
    %218 = tpu.matmul %217, %3, %cst_70 {dimension_numbers = #tpu.dot_dimension_numbers<[1], [0], [0], [1], [0, 0, 1, 1], [], []>} : vector<8x128xf32>, vector<128x64xf32>, vector<8x64xf32> -> vector<8x64xf32>
    %219 = arith.addf %218, %11 : vector<8x64xf32>
    %220 = vector.broadcast %214 : f32 to vector<8x64xf32>
    %221 = arith.mulf %220, %219 : vector<8x64xf32>
    %222 = arith.addf %212, %221 : vector<8x64xf32>
    %cst_71 = arith.constant dense<0.000000e+00> : vector<8x128xf32>
    %223 = tpu.matmul %222, %1, %cst_71 {dimension_numbers = #tpu.dot_dimension_numbers<[1], [0], [0], [1], [0, 0, 1, 1], [], []>} : vector<8x64xf32>, vector<64x128xf32>, vector<8x128xf32> -> vector<8x128xf32>
    %224 = arith.addf %223, %7 : vector<8x128xf32>
    %225 = math.tanh %224 : vector<8x128xf32>
    %cst_72 = arith.constant dense<0.000000e+00> : vector<8x64xf32>
    %226 = tpu.matmul %225, %3, %cst_72 {dimension_numbers = #tpu.dot_dimension_numbers<[1], [0], [0], [1], [0, 0, 1, 1], [], []>} : vector<8x128xf32>, vector<128x64xf32>, vector<8x64xf32> -> vector<8x64xf32>
    %227 = arith.addf %226, %11 : vector<8x64xf32>
    %228 = vector.broadcast %214 : f32 to vector<8x64xf32>
    %229 = arith.mulf %228, %227 : vector<8x64xf32>
    %230 = arith.addf %212, %229 : vector<8x64xf32>
    %cst_73 = arith.constant dense<0.000000e+00> : vector<8x128xf32>
    %231 = tpu.matmul %230, %1, %cst_73 {dimension_numbers = #tpu.dot_dimension_numbers<[1], [0], [0], [1], [0, 0, 1, 1], [], []>} : vector<8x64xf32>, vector<64x128xf32>, vector<8x128xf32> -> vector<8x128xf32>
    %232 = arith.addf %231, %7 : vector<8x128xf32>
    %233 = math.tanh %232 : vector<8x128xf32>
    %cst_74 = arith.constant dense<0.000000e+00> : vector<8x64xf32>
    %234 = tpu.matmul %233, %3, %cst_74 {dimension_numbers = #tpu.dot_dimension_numbers<[1], [0], [0], [1], [0, 0, 1, 1], [], []>} : vector<8x128xf32>, vector<128x64xf32>, vector<8x64xf32> -> vector<8x64xf32>
    %235 = arith.addf %234, %11 : vector<8x64xf32>
    %236 = vector.broadcast %213 : f32 to vector<8x64xf32>
    %237 = arith.mulf %236, %235 : vector<8x64xf32>
    %238 = arith.addf %212, %237 : vector<8x64xf32>
    %cst_75 = arith.constant dense<0.000000e+00> : vector<8x128xf32>
    %239 = tpu.matmul %238, %1, %cst_75 {dimension_numbers = #tpu.dot_dimension_numbers<[1], [0], [0], [1], [0, 0, 1, 1], [], []>} : vector<8x64xf32>, vector<64x128xf32>, vector<8x128xf32> -> vector<8x128xf32>
    %240 = arith.addf %239, %7 : vector<8x128xf32>
    %241 = math.tanh %240 : vector<8x128xf32>
    %cst_76 = arith.constant dense<0.000000e+00> : vector<8x64xf32>
    %242 = tpu.matmul %241, %3, %cst_76 {dimension_numbers = #tpu.dot_dimension_numbers<[1], [0], [0], [1], [0, 0, 1, 1], [], []>} : vector<8x128xf32>, vector<128x64xf32>, vector<8x64xf32> -> vector<8x64xf32>
    %243 = arith.addf %242, %11 : vector<8x64xf32>
    %cst_77 = arith.constant 0.166666672 : f32
    %244 = arith.mulf %213, %cst_77 : f32
    %245 = arith.addf %227, %235 : vector<8x64xf32>
    %cst_78 = arith.constant 2.000000e+00 : f32
    %246 = vector.broadcast %cst_78 : f32 to vector<8x64xf32>
    %247 = arith.mulf %246, %245 : vector<8x64xf32>
    %248 = arith.addf %219, %247 : vector<8x64xf32>
    %249 = arith.addf %248, %243 : vector<8x64xf32>
    %250 = vector.broadcast %244 : f32 to vector<8x64xf32>
    %251 = arith.mulf %250, %249 : vector<8x64xf32>
    %252 = arith.addf %212, %251 : vector<8x64xf32>
    %c6 = arith.constant 6 : index
    %253 = memref.load %arg1[%c6] : memref<7xf32, #tpu.memory_space<smem>>
    %cst_79 = arith.constant 5.000000e-01 : f32
    %254 = arith.mulf %cst_79, %253 : f32
    %cst_80 = arith.constant dense<0.000000e+00> : vector<8x128xf32>
    %255 = tpu.matmul %252, %1, %cst_80 {dimension_numbers = #tpu.dot_dimension_numbers<[1], [0], [0], [1], [0, 0, 1, 1], [], []>} : vector<8x64xf32>, vector<64x128xf32>, vector<8x128xf32> -> vector<8x128xf32>
    %256 = arith.addf %255, %7 : vector<8x128xf32>
    %257 = math.tanh %256 : vector<8x128xf32>
    %cst_81 = arith.constant dense<0.000000e+00> : vector<8x64xf32>
    %258 = tpu.matmul %257, %3, %cst_81 {dimension_numbers = #tpu.dot_dimension_numbers<[1], [0], [0], [1], [0, 0, 1, 1], [], []>} : vector<8x128xf32>, vector<128x64xf32>, vector<8x64xf32> -> vector<8x64xf32>
    %259 = arith.addf %258, %11 : vector<8x64xf32>
    %260 = vector.broadcast %254 : f32 to vector<8x64xf32>
    %261 = arith.mulf %260, %259 : vector<8x64xf32>
    %262 = arith.addf %252, %261 : vector<8x64xf32>
    %cst_82 = arith.constant dense<0.000000e+00> : vector<8x128xf32>
    %263 = tpu.matmul %262, %1, %cst_82 {dimension_numbers = #tpu.dot_dimension_numbers<[1], [0], [0], [1], [0, 0, 1, 1], [], []>} : vector<8x64xf32>, vector<64x128xf32>, vector<8x128xf32> -> vector<8x128xf32>
    %264 = arith.addf %263, %7 : vector<8x128xf32>
    %265 = math.tanh %264 : vector<8x128xf32>
    %cst_83 = arith.constant dense<0.000000e+00> : vector<8x64xf32>
    %266 = tpu.matmul %265, %3, %cst_83 {dimension_numbers = #tpu.dot_dimension_numbers<[1], [0], [0], [1], [0, 0, 1, 1], [], []>} : vector<8x128xf32>, vector<128x64xf32>, vector<8x64xf32> -> vector<8x64xf32>
    %267 = arith.addf %266, %11 : vector<8x64xf32>
    %268 = vector.broadcast %254 : f32 to vector<8x64xf32>
    %269 = arith.mulf %268, %267 : vector<8x64xf32>
    %270 = arith.addf %252, %269 : vector<8x64xf32>
    %cst_84 = arith.constant dense<0.000000e+00> : vector<8x128xf32>
    %271 = tpu.matmul %270, %1, %cst_84 {dimension_numbers = #tpu.dot_dimension_numbers<[1], [0], [0], [1], [0, 0, 1, 1], [], []>} : vector<8x64xf32>, vector<64x128xf32>, vector<8x128xf32> -> vector<8x128xf32>
    %272 = arith.addf %271, %7 : vector<8x128xf32>
    %273 = math.tanh %272 : vector<8x128xf32>
    %cst_85 = arith.constant dense<0.000000e+00> : vector<8x64xf32>
    %274 = tpu.matmul %273, %3, %cst_85 {dimension_numbers = #tpu.dot_dimension_numbers<[1], [0], [0], [1], [0, 0, 1, 1], [], []>} : vector<8x128xf32>, vector<128x64xf32>, vector<8x64xf32> -> vector<8x64xf32>
    %275 = arith.addf %274, %11 : vector<8x64xf32>
    %276 = vector.broadcast %253 : f32 to vector<8x64xf32>
    %277 = arith.mulf %276, %275 : vector<8x64xf32>
    %278 = arith.addf %252, %277 : vector<8x64xf32>
    %cst_86 = arith.constant dense<0.000000e+00> : vector<8x128xf32>
    %279 = tpu.matmul %278, %1, %cst_86 {dimension_numbers = #tpu.dot_dimension_numbers<[1], [0], [0], [1], [0, 0, 1, 1], [], []>} : vector<8x64xf32>, vector<64x128xf32>, vector<8x128xf32> -> vector<8x128xf32>
    %280 = arith.addf %279, %7 : vector<8x128xf32>
    %281 = math.tanh %280 : vector<8x128xf32>
    %cst_87 = arith.constant dense<0.000000e+00> : vector<8x64xf32>
    %282 = tpu.matmul %281, %3, %cst_87 {dimension_numbers = #tpu.dot_dimension_numbers<[1], [0], [0], [1], [0, 0, 1, 1], [], []>} : vector<8x128xf32>, vector<128x64xf32>, vector<8x64xf32> -> vector<8x64xf32>
    %283 = arith.addf %282, %11 : vector<8x64xf32>
    %cst_88 = arith.constant 0.166666672 : f32
    %284 = arith.mulf %253, %cst_88 : f32
    %285 = arith.addf %267, %275 : vector<8x64xf32>
    %cst_89 = arith.constant 2.000000e+00 : f32
    %286 = vector.broadcast %cst_89 : f32 to vector<8x64xf32>
    %287 = arith.mulf %286, %285 : vector<8x64xf32>
    %288 = arith.addf %259, %287 : vector<8x64xf32>
    %289 = arith.addf %288, %283 : vector<8x64xf32>
    %290 = vector.broadcast %284 : f32 to vector<8x64xf32>
    %291 = arith.mulf %290, %289 : vector<8x64xf32>
    %292 = arith.addf %252, %291 : vector<8x64xf32>
    %293 = vector.shape_cast %12 : vector<8x64xf32> to vector<1x8x64xf32>
    %294 = vector.shape_cast %52 : vector<8x64xf32> to vector<1x8x64xf32>
    %295 = vector.shape_cast %92 : vector<8x64xf32> to vector<1x8x64xf32>
    %296 = vector.shape_cast %132 : vector<8x64xf32> to vector<1x8x64xf32>
    %297 = vector.shape_cast %172 : vector<8x64xf32> to vector<1x8x64xf32>
    %298 = vector.shape_cast %212 : vector<8x64xf32> to vector<1x8x64xf32>
    %299 = vector.shape_cast %252 : vector<8x64xf32> to vector<1x8x64xf32>
    %300 = vector.shape_cast %292 : vector<8x64xf32> to vector<1x8x64xf32>
    %301 = tpu.concatenate %293, %294, %295, %296, %297, %298, %299, %300 in 0 : vector<1x8x64xf32>, vector<1x8x64xf32>, vector<1x8x64xf32>, vector<1x8x64xf32>, vector<1x8x64xf32>, vector<1x8x64xf32>, vector<1x8x64xf32>, vector<1x8x64xf32> -> vector<8x8x64xf32>
    %302 = vector.shape_cast %301 : vector<8x8x64xf32> to vector<8x512xf32>
    %c0_90 = arith.constant 0 : index
    %c0_91 = arith.constant 0 : index
    %c0_92 = arith.constant 0 : index
    %303 = vector.load %arg7[%c0_90, %c0_91, %c0_92] : memref<1x8x512xf32, #tpu.memory_space<vmem>>, vector<1x8x512xf32>
    %304 = vector.shape_cast %303 : vector<1x8x512xf32> to vector<8x512xf32>
    %305 = vector.shape_cast %302 : vector<8x512xf32> to vector<1x8x512xf32>
    tpu.vector_store %arg7[%c0_90, %c0_91, %c0_92], %305 {strides = array<i32>} : memref<1x8x512xf32, #tpu.memory_space<vmem>>, vector<1x8x512xf32>,
    return
  }
  func.func @transform_0(%arg0: i32) -> i32 {
    %c0_i32 = arith.constant 0 : i32
    %c0_i32_0 = arith.constant 0 : i32
    return %c0_i32 : i32
  }
  func.func @transform_1(%arg0: i32) -> (i32, i32) {
    %c0_i32 = arith.constant 0 : i32
    %c0_i32_0 = arith.constant 0 : i32
    %c0_i32_1 = arith.constant 0 : i32
    return %c0_i32, %c0_i32_0 : i32, i32
  }
  func.func @transform_2(%arg0: i32) -> (i32, i32, i32) {
    %c0_i32 = arith.constant 0 : i32
    %c0_i32_0 = arith.constant 0 : i32
    %c0_i32_1 = arith.constant 0 : i32
    return %arg0, %c0_i32, %c0_i32_0 : i32, i32, i32
  }
  func.func @transform_3(%arg0: i32) -> (i32, i32, i32) {
    %c0_i32 = arith.constant 0 : i32
    %c0_i32_0 = arith.constant 0 : i32
    %c0_i32_1 = arith.constant 0 : i32
    return %arg0, %c0_i32, %c0_i32_0 : i32, i32, i32
  }
  func.func @transform_4(%arg0: i32) -> (i32, i32, i32) {
    %c0_i32 = arith.constant 0 : i32
    %c0_i32_0 = arith.constant 0 : i32
    %c0_i32_1 = arith.constant 0 : i32
    return %arg0, %c0_i32, %c0_i32_0 : i32, i32, i32
  }
  func.func @transform_5(%arg0: i32) -> (i32, i32, i32) {
    %c0_i32 = arith.constant 0 : i32
    %c0_i32_0 = arith.constant 0 : i32
    %c0_i32_1 = arith.constant 0 : i32
    return %arg0, %c0_i32, %c0_i32_0 : i32, i32, i32
  }
  func.func @transform_6(%arg0: i32) -> (i32, i32, i32) {
    %c0_i32 = arith.constant 0 : i32
    %c0_i32_0 = arith.constant 0 : i32
    %c0_i32_1 = arith.constant 0 : i32
    return %arg0, %c0_i32, %c0_i32_0 : i32, i32, i32
  }
}

</mosaic_0001>

<bundles_post_ra>
// kernel: tpu_custom_call.1
= control target key start
LH: loop header
LB: loop body
LE: loop exit
PB: predicated region body
PF: predicated region fallthrough
CT: control target
= control target key end

     0   :  { %11 = vsyncpa [#allocation4], 0  ;;  %s9003_s0 = inlined_call_operand.vmem [shape: f32[7], index: 0, kind: input, shape index: {}]   ;;  %s9004_s1 = inlined_call_operand.vmem [shape: f32[8,64], index: 1, kind: input, shape index: {}]   ;;  %s9005_s2 = inlined_call_operand.vmem [shape: f32[1,64,128], index: 2, kind: input, shape index: {}]   ;;  %s9006_s3 = inlined_call_operand.vmem [shape: f32[1,1,128], index: 3, kind: input, shape index: {}]   ;;  %s9007_s4 = inlined_call_operand.vmem [shape: f32[1,128,64], index: 4, kind: input, shape index: {}]   ;;  %s9008_s5 = inlined_call_operand.vmem [shape: f32[1,1,64], index: 5, kind: input, shape index: {}]   ;;  %s9009_s6 = inlined_call_operand.hbm [shape: f32[1,8,512], index: 6, kind: output, shape index: {}]  }
   0x1   :  { %12 = vsyncpa [#allocation3], 0  ;;  %s19_s23 = sshll.u32 %s9003_s0, 4  ;;  %s20_s23 = int_to_ptr.vmem [resolvable:$true] %s19_s23 }
   0x2   :  { %s7763_s24 = scalar_lea.vmem %s20_s23, 16  ;;  %p7768_p1 = scmp.lt.s32.totalorder %s20_s23, %s20_s23 }
   0x3   :  { %p7764_p0 = scmp.ne.s32.totalorder %s20_s23, %s7763_s24  ;;  %p7769_p2 = scmp.lt.s32.totalorder %s7763_s24, %s7763_s24 }
   0x5   :  { %p7770_p3 = por %p7769_p2, %p7768_p1 }
   0x7   :  { %p7771_p4 = pnand %p7770_p3, %p7764_p0 }
   0x9   :  { %7774 = shalt.err (!%p7771_p4)
}
   0xa   :  { %s7801_s25 = smov [#allocation2]  }
   0xb   :  { %22 = dma.vmem_to_smem %s20_s23, 16, %s7801_s25, [#allocation4]  }
   0xc   :  { %7797 = dma.done.wait [#allocation4], 16  }
   0xd   :  { %7798 = vsyncadd [#allocation4], 4294967280 }
   0xe   :  { %36 = sfence }
   0xf   :  { %v37_v0 = vld [vmem:[%s9005_s2] sm:$0xff]  ;;  %v38_v1 = vld [vmem:[%s9005_s2 + $0x8] sm:$0xff]  ;;  %v39_v2 = vld [vmem:[%s9005_s2 + $0x10] sm:$0xff]  ;;  %v7802_v3 = vmov 0.0|0.0   ;;  %vm7803_vm0 = vmmov 0   ;;  %v7804_v6 = vmov 0.0  }
  0x10   :  { %6686 = vmatprep.subr.bf16.mxu1 %v7802_v3  ;;  %v7857_v4 = vpack.c.bf16 %v38_v1, %v37_v0  ;;  %v40_v5 = vld [vmem:[%s9005_s2 + $0x18] sm:$0xff]  ;;  %5190 = vmatprep.mubr.msk.f32.mxu1 %vm7803_vm0, %v7804_v6  ;;  %v41_v8 = vld [vmem:[%s9005_s2 + $0x20] sm:$0xff]  ;;  %v42_v9 = vld [vmem:[%s9005_s2 + $0x28] sm:$0xff]  ;;  %vm78_vm1 = vcmask 523264   ;;  %s8155_s0 = sld [smem:[#allocation2 + $0x1]]  ;;  %s8299_s8 = sld [smem:[#allocation2 + $0x2]] }
  0x11   :  { %6722 = vmatprep.subr.bf16.mxu0 %v7802_v3  ;;  %5244 = vmatprep.mubr.msk.f32.mxu0 %vm7803_vm0, %v7804_v6  ;;  %v7868_v7 = vpack.c.bf16 %v40_v5, %v39_v2  ;;  %v7880_v10 = vpack.c.bf16 %v42_v9, %v41_v8  ;;  %v43_v11 = vld [vmem:[%s9005_s2 + $0x30] sm:$0xff]  ;;  %v44_v12 = vld [vmem:[%s9005_s2 + $0x38] sm:$0xff]  ;;  %v45_v14 = vld [vmem:[%s9007_s4] sm:$0xff]  ;;  %s8443_s11 = sld [smem:[#allocation2 + $0x3]]  ;;  %s8597_s18 = sld [smem:[#allocation2 + $0x4]] }
  0x12   :  { %6688 = vmatpush3.bf16.msra.mxu1 %v7857_v4  ;;  %6724 = vmatpush3.bf16.msra.mxu0 %v7857_v4  ;;  %v7892_v13 = vpack.c.bf16 %v44_v12, %v43_v11  ;;  %v46_v15 = vld [vmem:[%s9007_s4 + $0x8] sm:$0xff]  ;;  %v7907_v16 = vld [vmem:[%s9004_s1] sm:$0xff]  ;;  %v47_v18 = vld [vmem:[%s9007_s4 + $0x10] sm:$0xff]  ;;  %s8741_s2 = sld [smem:[#allocation2 + $0x5]]  ;;  %s8885_s23 = sld [smem:[#allocation2 + $0x6]] }
  0x13   :  { %6689 = vmatprep.subr.bf16.mxu1 %v7802_v3  ;;  %6725 = vmatprep.subr.bf16.mxu0 %v7802_v3  ;;  %v7909_v17 = vpack.c.bf16 %v46_v15, %v45_v14  ;;  %v48_v19 = vld [vmem:[%s9007_s4 + $0x18] sm:$0xff]  ;;  %v49_v21 = vld [vmem:[%s9007_s4 + $0x20] sm:$0xff]  ;;  %v50_v22 = vld [vmem:[%s9007_s4 + $0x28] sm:$0xff] }
  0x14   :  { %v7923_v20 = vpack.c.bf16 %v48_v19, %v47_v18  ;;  %v7935_v23 = vpack.c.bf16 %v50_v22, %v49_v21  ;;  %v51_v24 = vld [vmem:[%s9007_s4 + $0x30] sm:$0xff]  ;;  %v52_v25 = vld [vmem:[%s9007_s4 + $0x38] sm:$0xff]  ;;  %v53_v27 = vld [vmem:[%s9007_s4 + $0x40] sm:$0xff] }
  0x15   :  { %v7945_v26 = vpack.c.bf16 %v52_v25, %v51_v24  ;;  %v54_v28 = vld [vmem:[%s9007_s4 + $0x48] sm:$0xff]  ;;  %v55_v30 = vld [vmem:[%s9007_s4 + $0x50] sm:$0xff]  ;;  %v56_v31 = vld [vmem:[%s9007_s4 + $0x58] sm:$0xff] }
  0x16   :  { %6691 = vmatpush3.bf16.msra.mxu1 %v7868_v7  ;;  %6727 = vmatpush3.bf16.msra.mxu0 %v7868_v7  ;;  %v7955_v29 = vpack.c.bf16 %v54_v28, %v53_v27  ;;  %v7966_v32 = vpack.c.bf16 %v56_v31, %v55_v30  ;;  %v57_v33 = vld [vmem:[%s9007_s4 + $0x60] sm:$0xff]  ;;  %v58_v34 = vld [vmem:[%s9007_s4 + $0x68] sm:$0xff]  ;;  %v59_v36 = vld [vmem:[%s9007_s4 + $0x70] sm:$0xff]  ;;  %s672_s30 = smul.f32 0.5, %s8155_s0 }
  0x17   :  { %6692 = vmatprep.subr.bf16.mxu1 %v7802_v3  ;;  %6728 = vmatprep.subr.bf16.mxu0 %v7802_v3  ;;  %v7976_v35 = vpack.c.bf16 %v58_v34, %v57_v33  ;;  %v60_v37 = vld [vmem:[%s9007_s4 + $0x78] sm:$0xff]  ;;  %v7993_v39 = vld [vmem:[%s9006_s3] ss:$0 sm:$0xff]  ;;  %s8006_s4 = sld [smem:[#allocation2]]  ;;  %s1257_s7 = smul.f32 0.16666667, %s8155_s0 }
  0x18   :  { %v7985_v38 = vpack.c.bf16 %v60_v37, %v59_v36  ;;  %v8012_v44 = vld [vmem:[%s9008_s5] ss:$0 sm:$0xff]  ;;  %s1266_s9 = smul.f32 0.5, %s8299_s8 }
  0x19   :  { %s1851_s10 = smul.f32 0.16666667, %s8299_s8 }
  0x1a   :  { %6694 = vmatpush3.bf16.msra.mxu1 %v7880_v10  ;;  %6730 = vmatpush3.bf16.msra.mxu0 %v7880_v10  ;;  %s1860_s12 = smul.f32 0.5, %s8443_s11 }
  0x1b   :  { %6695 = vmatprep.subr.bf16.mxu1 %v7802_v3  ;;  %6731 = vmatprep.subr.bf16.mxu0 %v7802_v3  ;;  %s2445_s17 = smul.f32 0.16666667, %s8443_s11 }
  0x1c   :  { %s2454_s19 = smul.f32 0.5, %s8597_s18 }
  0x1d   :  { %s77_s26 = smul.f32 0.5, %s8006_s4  ;;  %v516_v1 = vstv %s8006_s4 }
  0x1e   :  { %6697 = vmatpush3.bf16.msra.mxu1 %v7892_v13  ;;  %6733 = vmatpush3.bf16.msra.mxu0 %v7892_v13  ;;  %s663_s29 = smul.f32 0.16666667, %s8006_s4 }
  0x1f   :  { %6698 = vmatprep.subr.bf16.mxu1 %v7802_v3  ;;  %6734 = vmatprep.subr.bf16.mxu0 %v7802_v3  ;;  %v223_v46 = vstv %s77_s26  ;;  %s3039_s20 = smul.f32 0.16666667, %s8597_s18 }
  0x20   :  { %v668_v27 = vstv %s663_s29  ;;  %s3048_s21 = smul.f32 0.5, %s8741_s2  ;;  %s7808_s29 = smov [#allocation5]  }
  0x21   :  { %5191 = vmatmul.mubr.msk.f32.vlgmr.msra.gmra.mrb[0].mxu1 %vm78_vm1, %v7907_v16  ;;  %s3633_s22 = smul.f32 0.16666667, %s8741_s2 }
  0x22   :  { %6700 = vmatpush3.bf16.msra.mxu1 %v7909_v17  ;;  %5225 = vmatprep.mubr.msk.f32.mxu1 %vm7803_vm0, %v7804_v6  ;;  %s3642_s24 = smul.f32 0.5, %s8885_s23 }
  0x23   :  { %6701 = vmatprep.subr.bf16.mxu1 %v7802_v3 }
  0x26   :  { %6703 = vmatpush3.bf16.msra.mxu1 %v7923_v20 }
  0x27   :  { %6704 = vmatprep.subr.bf16.mxu1 %v7802_v3 }
  0x2a   :  { %6706 = vmatpush3.bf16.msra.mxu1 %v7935_v23 }
  0x2b   :  { %6707 = vmatprep.subr.bf16.mxu1 %v7802_v3 }
  0x2e   :  { %6709 = vmatpush3.bf16.msra.mxu1 %v7945_v26 }
  0x2f   :  { %6710 = vmatprep.subr.bf16.mxu1 %v7802_v3 }
  0x32   :  { %6712 = vmatpush3.bf16.msra.mxu1 %v7955_v29 }
  0x33   :  { %6713 = vmatprep.subr.bf16.mxu1 %v7802_v3 }
  0x36   :  { %6715 = vmatpush3.bf16.msra.mxu1 %v7966_v32 }
  0x37   :  { %6716 = vmatprep.subr.bf16.mxu1 %v7802_v3 }
  0x3a   :  { %6718 = vmatpush3.bf16.msra.mxu1 %v7976_v35 }
  0x3b   :  { %6719 = vmatprep.subr.bf16.mxu1 %v7802_v3 }
  0x3e   :  { %6721 = vmatpush3.bf16.msra.mxu1 %v7985_v38 }
  0x3f   :  { %6758 = vmatprep.subr.bf16.mxu1 %v7802_v3 }
  0xf4   :  { %v148_v40 = vpop.f32.mrb[0].mxu1 }
  0xf5   :  { %v149_v41 = vadd.f32 %v7993_v39, %v148_v40  ;;  %v5192_v42 = vpop.f32.mrb[1].mxu1  ;;  %v817_v40 = vstv %s672_s30 }
  0xf7   :  { %7702 = vtanh.f32 %v149_v41 }
 0x101   :  { %v7703_v43 = vpop.eup %7702 }
 0x102   :  { %5226 = vmatmul.mubr.f32.vlgmr.msra.gmra.mrb[2].mxu1 %v7703_v43 }
 0x103   :  { %6760 = vmatpush3.bf16.msra.mxu1 %v7857_v4  ;;  %5298 = vmatprep.mubr.msk.f32.mxu1 %vm7803_vm0, %v7804_v6 }
 0x104   :  { %6761 = vmatprep.subr.bf16.mxu1 %v7802_v3 }
 0x107   :  { %6763 = vmatpush3.bf16.msra.mxu1 %v7868_v7 }
 0x108   :  { %6764 = vmatprep.subr.bf16.mxu1 %v7802_v3 }
 0x10b   :  { %6766 = vmatpush3.bf16.msra.mxu1 %v7880_v10 }
 0x10c   :  { %6767 = vmatprep.subr.bf16.mxu1 %v7802_v3 }
 0x10f   :  { %6769 = vmatpush3.bf16.msra.mxu1 %v7892_v13 }
 0x110   :  { %6770 = vmatprep.subr.bf16.mxu1 %v7802_v3 }
 0x1d5   :  { %v219_v45 = vpop.f32.mrb[2].mxu1 }
 0x1d6   :  { %v8015_v47 = vadd.f32 %v8012_v44, %v219_v45  ;;  %v5227_v48 = vpop.f32.mrb[3].mxu1 }
 0x1d8   :  { %v224_v49 = vmul.f32 %v223_v46, %v8015_v47 }
 0x1da   :  { %v225_v50 = vadd.f32 %v224_v49, %v7907_v16 }
 0x1dc   :  { %5245 = vmatmul.mubr.msk.f32.vlgmr.msra.gmra.mrb[0].mxu0 %vm78_vm1, %v225_v50 }
 0x1dd   :  { %6736 = vmatpush3.bf16.msra.mxu0 %v7909_v17  ;;  %5279 = vmatprep.mubr.msk.f32.mxu0 %vm7803_vm0, %v7804_v6 }
 0x1de   :  { %6737 = vmatprep.subr.bf16.mxu0 %v7802_v3 }
 0x1e1   :  { %6739 = vmatpush3.bf16.msra.mxu0 %v7923_v20 }
 0x1e2   :  { %6740 = vmatprep.subr.bf16.mxu0 %v7802_v3 }
 0x1e5   :  { %6742 = vmatpush3.bf16.msra.mxu0 %v7935_v23 }
 0x1e6   :  { %6743 = vmatprep.subr.bf16.mxu0 %v7802_v3 }
 0x1e9   :  { %6745 = vmatpush3.bf16.msra.mxu0 %v7945_v26 }
 0x1ea   :  { %6746 = vmatprep.subr.bf16.mxu0 %v7802_v3 }
 0x1ed   :  { %6748 = vmatpush3.bf16.msra.mxu0 %v7955_v29 }
 0x1ee   :  { %6749 = vmatprep.subr.bf16.mxu0 %v7802_v3 }
 0x1f1   :  { %6751 = vmatpush3.bf16.msra.mxu0 %v7966_v32 }
 0x1f2   :  { %6752 = vmatprep.subr.bf16.mxu0 %v7802_v3 }
 0x1f5   :  { %6754 = vmatpush3.bf16.msra.mxu0 %v7976_v35 }
 0x1f6   :  { %6755 = vmatprep.subr.bf16.mxu0 %v7802_v3 }
 0x1f9   :  { %6757 = vmatpush3.bf16.msra.mxu0 %v7985_v38 }
 0x1fa   :  { %6794 = vmatprep.subr.bf16.mxu0 %v7802_v3 }
 0x2af   :  { %v295_v51 = vpop.f32.mrb[0].mxu0 }
 0x2b0   :  { %v296_v52 = vadd.f32 %v7993_v39, %v295_v51  ;;  %v5246_v53 = vpop.f32.mrb[1].mxu0 }
 0x2b2   :  { %7704 = vtanh.f32 %v296_v52 }
 0x2bc   :  { %v7705_v54 = vpop.eup %7704 }
 0x2bd   :  { %5280 = vmatmul.mubr.f32.vlgmr.msra.gmra.mrb[2].mxu0 %v7705_v54 }
 0x2be   :  { %6796 = vmatpush3.bf16.msra.mxu0 %v7857_v4  ;;  %5352 = vmatprep.mubr.msk.f32.mxu0 %vm7803_vm0, %v7804_v6 }
 0x2bf   :  { %6797 = vmatprep.subr.bf16.mxu0 %v7802_v3 }
 0x2c2   :  { %6799 = vmatpush3.bf16.msra.mxu0 %v7868_v7 }
 0x2c3   :  { %6800 = vmatprep.subr.bf16.mxu0 %v7802_v3 }
 0x2c6   :  { %6802 = vmatpush3.bf16.msra.mxu0 %v7880_v10 }
 0x2c7   :  { %6803 = vmatprep.subr.bf16.mxu0 %v7802_v3 }
 0x2ca   :  { %6805 = vmatpush3.bf16.msra.mxu0 %v7892_v13 }
 0x2cb   :  { %6806 = vmatprep.subr.bf16.mxu0 %v7802_v3 }
 0x390   :  { %v366_v55 = vpop.f32.mrb[2].mxu0 }
 0x391   :  { %v8050_v56 = vadd.f32 %v8012_v44, %v366_v55  ;;  %v5281_v57 = vpop.f32.mrb[3].mxu0 }
 0x393   :  { %v370_v58 = vmul.f32 %v8050_v56, %v223_v46 }
 0x395   :  { %v371_v59 = vadd.f32 %v370_v58, %v7907_v16 }
 0x397   :  { %5299 = vmatmul.mubr.msk.f32.vlgmr.msra.gmra.mrb[4].mxu1 %vm78_vm1, %v371_v59 }
 0x398   :  { %6772 = vmatpush3.bf16.msra.mxu1 %v7909_v17  ;;  %5333 = vmatprep.mubr.msk.f32.mxu1 %vm7803_vm0, %v7804_v6 }
 0x399   :  { %6773 = vmatprep.subr.bf16.mxu1 %v7802_v3 }
 0x39c   :  { %6775 = vmatpush3.bf16.msra.mxu1 %v7923_v20 }
 0x39d   :  { %6776 = vmatprep.subr.bf16.mxu1 %v7802_v3 }
 0x3a0   :  { %6778 = vmatpush3.bf16.msra.mxu1 %v7935_v23 }
 0x3a1   :  { %6779 = vmatprep.subr.bf16.mxu1 %v7802_v3 }
 0x3a4   :  { %6781 = vmatpush3.bf16.msra.mxu1 %v7945_v26 }
 0x3a5   :  { %6782 = vmatprep.subr.bf16.mxu1 %v7802_v3 }
 0x3a8   :  { %6784 = vmatpush3.bf16.msra.mxu1 %v7955_v29 }
 0x3a9   :  { %6785 = vmatprep.subr.bf16.mxu1 %v7802_v3 }
 0x3ac   :  { %6787 = vmatpush3.bf16.msra.mxu1 %v7966_v32 }
 0x3ad   :  { %6788 = vmatprep.subr.bf16.mxu1 %v7802_v3 }
 0x3b0   :  { %6790 = vmatpush3.bf16.msra.mxu1 %v7976_v35 }
 0x3b1   :  { %6791 = vmatprep.subr.bf16.mxu1 %v7802_v3 }
 0x3b4   :  { %6793 = vmatpush3.bf16.msra.mxu1 %v7985_v38 }
 0x3b5   :  { %6830 = vmatprep.subr.bf16.mxu1 %v7802_v3 }
 0x46a   :  { %v441_v60 = vpop.f32.mrb[4].mxu1 }
 0x46b   :  { %v442_v61 = vadd.f32 %v7993_v39, %v441_v60  ;;  %v5300_v62 = vpop.f32.mrb[5].mxu1  ;;  %v1110_v60 = vstv %s8155_s0  ;;  %s4401_s0 = sshll.u32 %s7808_s29, 4  ;;  %s4402_s0 = int_to_ptr.vmem [resolvable:$true] %s4401_s0 }
 0x46c   :  { %s7775_s30 = scalar_lea.vmem %s4402_s0, 512  ;;  %p7780_p6 = scmp.lt.s32.totalorder %s4402_s0, %s4402_s0 }
 0x46d   :  { %7706 = vtanh.f32 %v442_v61  ;;  %p7776_p5 = scmp.ne.s32.totalorder %s4402_s0, %s7775_s30  ;;  %p7781_p7 = scmp.lt.s32.totalorder %s7775_s30, %s7775_s30 }
 0x46f   :  { %p7782_p8 = por %p7781_p7, %p7780_p6 }
 0x471   :  { %p7783_p9 = pnand %p7782_p8, %p7776_p5 }
 0x477   :  { %v7707_v63 = vpop.eup %7706 }
 0x478   :  { %5334 = vmatmul.mubr.f32.vlgmr.msra.gmra.mrb[6].mxu1 %v7707_v63 }
 0x479   :  { %6832 = vmatpush3.bf16.msra.mxu1 %v7857_v4  ;;  %5406 = vmatprep.mubr.msk.f32.mxu1 %vm7803_vm0, %v7804_v6 }
 0x47a   :  { %6833 = vmatprep.subr.bf16.mxu1 %v7802_v3 }
 0x47d   :  { %6835 = vmatpush3.bf16.msra.mxu1 %v7868_v7 }
 0x47e   :  { %6836 = vmatprep.subr.bf16.mxu1 %v7802_v3 }
 0x481   :  { %6838 = vmatpush3.bf16.msra.mxu1 %v7880_v10 }
 0x482   :  { %6839 = vmatprep.subr.bf16.mxu1 %v7802_v3 }
 0x485   :  { %6841 = vmatpush3.bf16.msra.mxu1 %v7892_v13 }
 0x486   :  { %6842 = vmatprep.subr.bf16.mxu1 %v7802_v3 }
 0x54b   :  { %v512_v0 = vpop.f32.mrb[6].mxu1 }
 0x54c   :  { %v513_v2 = vadd.f32 %v8012_v44, %v512_v0  ;;  %v5335_v5 = vpop.f32.mrb[7].mxu1 }
 0x54e   :  { %v517_v8 = vmul.f32 %v516_v1, %v513_v2  ;;  %v664_v18 = vadd.f32 %v513_v2, %v8050_v56 }
 0x550   :  { %v518_v9 = vadd.f32 %v517_v8, %v7907_v16  ;;  %v665_v19 = vmul.f32 2.0, %v664_v18 }
 0x552   :  { %5353 = vmatmul.mubr.msk.f32.vlgmr.msra.gmra.mrb[4].mxu0 %vm78_vm1, %v518_v9  ;;  %v666_v24 = vadd.f32 %v665_v19, %v8015_v47  ;;  %v1262_v19 = vstv %s1257_s7 }
 0x553   :  { %6808 = vmatpush3.bf16.msra.mxu0 %v7909_v17  ;;  %5387 = vmatprep.mubr.msk.f32.mxu0 %vm7803_vm0, %v7804_v6 }
 0x554   :  { %6809 = vmatprep.subr.bf16.mxu0 %v7802_v3 }
 0x557   :  { %6811 = vmatpush3.bf16.msra.mxu0 %v7923_v20 }
 0x558   :  { %6812 = vmatprep.subr.bf16.mxu0 %v7802_v3 }
 0x55b   :  { %6814 = vmatpush3.bf16.msra.mxu0 %v7935_v23 }
 0x55c   :  { %6815 = vmatprep.subr.bf16.mxu0 %v7802_v3 }
 0x55f   :  { %6817 = vmatpush3.bf16.msra.mxu0 %v7945_v26 }
 0x560   :  { %6818 = vmatprep.subr.bf16.mxu0 %v7802_v3 }
 0x563   :  { %6820 = vmatpush3.bf16.msra.mxu0 %v7955_v29 }
 0x564   :  { %6821 = vmatprep.subr.bf16.mxu0 %v7802_v3 }
 0x567   :  { %6823 = vmatpush3.bf16.msra.mxu0 %v7966_v32 }
 0x568   :  { %6824 = vmatprep.subr.bf16.mxu0 %v7802_v3 }
 0x56b   :  { %6826 = vmatpush3.bf16.msra.mxu0 %v7976_v35 }
 0x56c   :  { %6827 = vmatprep.subr.bf16.mxu0 %v7802_v3 }
 0x56f   :  { %6829 = vmatpush3.bf16.msra.mxu0 %v7985_v38 }
 0x570   :  { %6866 = vmatprep.subr.bf16.mxu0 %v7802_v3 }
 0x625   :  { %v588_v11 = vpop.f32.mrb[4].mxu0 }
 0x626   :  { %v589_v12 = vadd.f32 %v7993_v39, %v588_v11  ;;  %v5354_v14 = vpop.f32.mrb[5].mxu0 }
 0x628   :  { %7708 = vtanh.f32 %v589_v12 }
 0x632   :  { %v7709_v15 = vpop.eup %7708 }
 0x633   :  { %5388 = vmatmul.mubr.f32.vlgmr.msra.gmra.mrb[6].mxu0 %v7709_v15 }
 0x634   :  { %6868 = vmatpush3.bf16.msra.mxu0 %v7857_v4  ;;  %5460 = vmatprep.mubr.msk.f32.mxu0 %vm7803_vm0, %v7804_v6 }
 0x635   :  { %6869 = vmatprep.subr.bf16.mxu0 %v7802_v3 }
 0x638   :  { %6871 = vmatpush3.bf16.msra.mxu0 %v7868_v7 }
 0x639   :  { %6872 = vmatprep.subr.bf16.mxu0 %v7802_v3 }
 0x63c   :  { %6874 = vmatpush3.bf16.msra.mxu0 %v7880_v10 }
 0x63d   :  { %6875 = vmatprep.subr.bf16.mxu0 %v7802_v3 }
 0x640   :  { %6877 = vmatpush3.bf16.msra.mxu0 %v7892_v13 }
 0x641   :  { %6878 = vmatprep.subr.bf16.mxu0 %v7802_v3 }
 0x706   :  { %v659_v21 = vpop.f32.mrb[6].mxu0 }
 0x707   :  { %v660_v22 = vadd.f32 %v8012_v44, %v659_v21  ;;  %v5389_v25 = vpop.f32.mrb[7].mxu0 }
 0x709   :  { %v667_v28 = vadd.f32 %v666_v24, %v660_v22 }
 0x70b   :  { %v669_v30 = vmul.f32 %v668_v27, %v667_v28 }
 0x70d   :  { %v8122_v31 = vadd.f32 %v669_v30, %v7907_v16 }
 0x70f   :  { %5407 = vmatmul.mubr.msk.f32.vlgmr.msra.gmra.mrb[8].mxu1 %vm78_vm1, %v8122_v31 }
 0x710   :  { %6844 = vmatpush3.bf16.msra.mxu1 %v7909_v17  ;;  %5441 = vmatprep.mubr.msk.f32.mxu1 %vm7803_vm0, %v7804_v6 }
 0x711   :  { %6845 = vmatprep.subr.bf16.mxu1 %v7802_v3 }
 0x714   :  { %6847 = vmatpush3.bf16.msra.mxu1 %v7923_v20 }
 0x715   :  { %6848 = vmatprep.subr.bf16.mxu1 %v7802_v3 }
 0x718   :  { %6850 = vmatpush3.bf16.msra.mxu1 %v7935_v23 }
 0x719   :  { %6851 = vmatprep.subr.bf16.mxu1 %v7802_v3 }
 0x71c   :  { %6853 = vmatpush3.bf16.msra.mxu1 %v7945_v26 }
 0x71d   :  { %6854 = vmatprep.subr.bf16.mxu1 %v7802_v3 }
 0x720   :  { %6856 = vmatpush3.bf16.msra.mxu1 %v7955_v29 }
 0x721   :  { %6857 = vmatprep.subr.bf16.mxu1 %v7802_v3 }
 0x724   :  { %6859 = vmatpush3.bf16.msra.mxu1 %v7966_v32 }
 0x725   :  { %6860 = vmatprep.subr.bf16.mxu1 %v7802_v3 }
 0x728   :  { %6862 = vmatpush3.bf16.msra.mxu1 %v7976_v35 }
 0x729   :  { %6863 = vmatprep.subr.bf16.mxu1 %v7802_v3 }
 0x72c   :  { %6865 = vmatpush3.bf16.msra.mxu1 %v7985_v38 }
 0x72d   :  { %6902 = vmatprep.subr.bf16.mxu1 %v7802_v3 }
 0x7e2   :  { %v742_v16 = vpop.f32.mrb[8].mxu1 }
 0x7e3   :  { %v743_v33 = vadd.f32 %v7993_v39, %v742_v16  ;;  %v5408_v34 = vpop.f32.mrb[9].mxu1 }
 0x7e5   :  { %7710 = vtanh.f32 %v743_v33  ;;  %v1411_v33 = vstv %s1266_s9 }
 0x7ef   :  { %v7711_v36 = vpop.eup %7710 }
 0x7f0   :  { %5442 = vmatmul.mubr.f32.vlgmr.msra.gmra.mrb[10].mxu1 %v7711_v36 }
 0x7f1   :  { %6904 = vmatpush3.bf16.msra.mxu1 %v7857_v4  ;;  %5514 = vmatprep.mubr.msk.f32.mxu1 %vm7803_vm0, %v7804_v6 }
 0x7f2   :  { %6905 = vmatprep.subr.bf16.mxu1 %v7802_v3 }
 0x7f5   :  { %6907 = vmatpush3.bf16.msra.mxu1 %v7868_v7 }
 0x7f6   :  { %6908 = vmatprep.subr.bf16.mxu1 %v7802_v3 }
 0x7f9   :  { %6910 = vmatpush3.bf16.msra.mxu1 %v7880_v10 }
 0x7fa   :  { %6911 = vmatprep.subr.bf16.mxu1 %v7802_v3 }
 0x7fd   :  { %6913 = vmatpush3.bf16.msra.mxu1 %v7892_v13 }
 0x7fe   :  { %6914 = vmatprep.subr.bf16.mxu1 %v7802_v3 }
 0x8c3   :  { %v813_v37 = vpop.f32.mrb[10].mxu1 }
 0x8c4   :  { %v8159_v41 = vadd.f32 %v8012_v44, %v813_v37  ;;  %v5443_v42 = vpop.f32.mrb[11].mxu1 }
 0x8c6   :  { %v818_v43 = vmul.f32 %v817_v40, %v8159_v41 }
 0x8c8   :  { %v819_v45 = vadd.f32 %v818_v43, %v8122_v31 }
 0x8ca   :  { %5461 = vmatmul.mubr.msk.f32.vlgmr.msra.gmra.mrb[8].mxu0 %vm78_vm1, %v819_v45 }
 0x8cb   :  { %6880 = vmatpush3.bf16.msra.mxu0 %v7909_v17  ;;  %5495 = vmatprep.mubr.msk.f32.mxu0 %vm7803_vm0, %v7804_v6 }
 0x8cc   :  { %6881 = vmatprep.subr.bf16.mxu0 %v7802_v3 }
 0x8cf   :  { %6883 = vmatpush3.bf16.msra.mxu0 %v7923_v20 }
 0x8d0   :  { %6884 = vmatprep.subr.bf16.mxu0 %v7802_v3 }
 0x8d3   :  { %6886 = vmatpush3.bf16.msra.mxu0 %v7935_v23 }
 0x8d4   :  { %6887 = vmatprep.subr.bf16.mxu0 %v7802_v3 }
 0x8d7   :  { %6889 = vmatpush3.bf16.msra.mxu0 %v7945_v26 }
 0x8d8   :  { %6890 = vmatprep.subr.bf16.mxu0 %v7802_v3 }
 0x8db   :  { %6892 = vmatpush3.bf16.msra.mxu0 %v7955_v29 }
 0x8dc   :  { %6893 = vmatprep.subr.bf16.mxu0 %v7802_v3 }
 0x8df   :  { %6895 = vmatpush3.bf16.msra.mxu0 %v7966_v32 }
 0x8e0   :  { %6896 = vmatprep.subr.bf16.mxu0 %v7802_v3 }
 0x8e3   :  { %6898 = vmatpush3.bf16.msra.mxu0 %v7976_v35 }
 0x8e4   :  { %6899 = vmatprep.subr.bf16.mxu0 %v7802_v3 }
 0x8e7   :  { %6901 = vmatpush3.bf16.msra.mxu0 %v7985_v38 }
 0x8e8   :  { %6938 = vmatprep.subr.bf16.mxu0 %v7802_v3 }
 0x99d   :  { %v889_v46 = vpop.f32.mrb[8].mxu0 }
 0x99e   :  { %v890_v47 = vadd.f32 %v7993_v39, %v889_v46  ;;  %v5462_v48 = vpop.f32.mrb[9].mxu0 }
 0x9a0   :  { %7712 = vtanh.f32 %v890_v47 }
 0x9aa   :  { %v7713_v49 = vpop.eup %7712 }
 0x9ab   :  { %5496 = vmatmul.mubr.f32.vlgmr.msra.gmra.mrb[10].mxu0 %v7713_v49 }
 0x9ac   :  { %6940 = vmatpush3.bf16.msra.mxu0 %v7857_v4  ;;  %5568 = vmatprep.mubr.msk.f32.mxu0 %vm7803_vm0, %v7804_v6 }
 0x9ad   :  { %6941 = vmatprep.subr.bf16.mxu0 %v7802_v3 }
 0x9b0   :  { %6943 = vmatpush3.bf16.msra.mxu0 %v7868_v7 }
 0x9b1   :  { %6944 = vmatprep.subr.bf16.mxu0 %v7802_v3 }
 0x9b4   :  { %6946 = vmatpush3.bf16.msra.mxu0 %v7880_v10 }
 0x9b5   :  { %6947 = vmatprep.subr.bf16.mxu0 %v7802_v3 }
 0x9b8   :  { %6949 = vmatpush3.bf16.msra.mxu0 %v7892_v13 }
 0x9b9   :  { %6950 = vmatprep.subr.bf16.mxu0 %v7802_v3 }
 0xa7e   :  { %v960_v50 = vpop.f32.mrb[10].mxu0 }
 0xa7f   :  { %v8194_v51 = vadd.f32 %v8012_v44, %v960_v50  ;;  %v5497_v52 = vpop.f32.mrb[11].mxu0 }
 0xa81   :  { %v964_v53 = vmul.f32 %v8194_v51, %v817_v40 }
 0xa83   :  { %v965_v54 = vadd.f32 %v964_v53, %v8122_v31 }
 0xa85   :  { %5515 = vmatmul.mubr.msk.f32.vlgmr.msra.gmra.mrb[12].mxu1 %vm78_vm1, %v965_v54 }
 0xa86   :  { %6916 = vmatpush3.bf16.msra.mxu1 %v7909_v17  ;;  %5549 = vmatprep.mubr.msk.f32.mxu1 %vm7803_vm0, %v7804_v6 }
 0xa87   :  { %6917 = vmatprep.subr.bf16.mxu1 %v7802_v3 }
 0xa8a   :  { %6919 = vmatpush3.bf16.msra.mxu1 %v7923_v20 }
 0xa8b   :  { %6920 = vmatprep.subr.bf16.mxu1 %v7802_v3 }
 0xa8e   :  { %6922 = vmatpush3.bf16.msra.mxu1 %v7935_v23 }
 0xa8f   :  { %6923 = vmatprep.subr.bf16.mxu1 %v7802_v3 }
 0xa92   :  { %6925 = vmatpush3.bf16.msra.mxu1 %v7945_v26 }
 0xa93   :  { %6926 = vmatprep.subr.bf16.mxu1 %v7802_v3 }
 0xa96   :  { %6928 = vmatpush3.bf16.msra.mxu1 %v7955_v29 }
 0xa97   :  { %6929 = vmatprep.subr.bf16.mxu1 %v7802_v3 }
 0xa9a   :  { %6931 = vmatpush3.bf16.msra.mxu1 %v7966_v32 }
 0xa9b   :  { %6932 = vmatprep.subr.bf16.mxu1 %v7802_v3 }
 0xa9e   :  { %6934 = vmatpush3.bf16.msra.mxu1 %v7976_v35 }
 0xa9f   :  { %6935 = vmatprep.subr.bf16.mxu1 %v7802_v3 }
 0xaa2   :  { %6937 = vmatpush3.bf16.msra.mxu1 %v7985_v38 }
 0xaa3   :  { %6974 = vmatprep.subr.bf16.mxu1 %v7802_v3 }
 0xb58   :  { %v1035_v55 = vpop.f32.mrb[12].mxu1 }
 0xb59   :  { %v1036_v56 = vadd.f32 %v7993_v39, %v1035_v55  ;;  %v5516_v57 = vpop.f32.mrb[13].mxu1 }
 0xb5b   :  { %7714 = vtanh.f32 %v1036_v56  ;;  %v1704_v56 = vstv %s8299_s8 }
 0xb65   :  { %v7715_v58 = vpop.eup %7714 }
 0xb66   :  { %5550 = vmatmul.mubr.f32.vlgmr.msra.gmra.mrb[14].mxu1 %v7715_v58 }
 0xb67   :  { %6976 = vmatpush3.bf16.msra.mxu1 %v7857_v4  ;;  %5622 = vmatprep.mubr.msk.f32.mxu1 %vm7803_vm0, %v7804_v6 }
 0xb68   :  { %6977 = vmatprep.subr.bf16.mxu1 %v7802_v3 }
 0xb6b   :  { %6979 = vmatpush3.bf16.msra.mxu1 %v7868_v7 }
 0xb6c   :  { %6980 = vmatprep.subr.bf16.mxu1 %v7802_v3 }
 0xb6f   :  { %6982 = vmatpush3.bf16.msra.mxu1 %v7880_v10 }
 0xb70   :  { %6983 = vmatprep.subr.bf16.mxu1 %v7802_v3 }
 0xb73   :  { %6985 = vmatpush3.bf16.msra.mxu1 %v7892_v13 }
 0xb74   :  { %6986 = vmatprep.subr.bf16.mxu1 %v7802_v3 }
 0xc39   :  { %v1106_v59 = vpop.f32.mrb[14].mxu1 }
 0xc3a   :  { %v1107_v61 = vadd.f32 %v8012_v44, %v1106_v59  ;;  %v5551_v62 = vpop.f32.mrb[15].mxu1 }
 0xc3c   :  { %v1111_v63 = vmul.f32 %v1110_v60, %v1107_v61  ;;  %v1258_v9 = vadd.f32 %v1107_v61, %v8194_v51 }
 0xc3e   :  { %v1112_v0 = vadd.f32 %v1111_v63, %v8122_v31  ;;  %v1259_v11 = vmul.f32 2.0, %v1258_v9 }
 0xc40   :  { %5569 = vmatmul.mubr.msk.f32.vlgmr.msra.gmra.mrb[12].mxu0 %vm78_vm1, %v1112_v0  ;;  %v1260_v15 = vadd.f32 %v1259_v11, %v8159_v41 }
 0xc41   :  { %6952 = vmatpush3.bf16.msra.mxu0 %v7909_v17  ;;  %5603 = vmatprep.mubr.msk.f32.mxu0 %vm7803_vm0, %v7804_v6 }
 0xc42   :  { %6953 = vmatprep.subr.bf16.mxu0 %v7802_v3 }
 0xc45   :  { %6955 = vmatpush3.bf16.msra.mxu0 %v7923_v20 }
 0xc46   :  { %6956 = vmatprep.subr.bf16.mxu0 %v7802_v3 }
 0xc49   :  { %6958 = vmatpush3.bf16.msra.mxu0 %v7935_v23 }
 0xc4a   :  { %6959 = vmatprep.subr.bf16.mxu0 %v7802_v3 }
 0xc4d   :  { %6961 = vmatpush3.bf16.msra.mxu0 %v7945_v26 }
 0xc4e   :  { %6962 = vmatprep.subr.bf16.mxu0 %v7802_v3 }
 0xc51   :  { %6964 = vmatpush3.bf16.msra.mxu0 %v7955_v29 }
 0xc52   :  { %6965 = vmatprep.subr.bf16.mxu0 %v7802_v3 }
 0xc55   :  { %6967 = vmatpush3.bf16.msra.mxu0 %v7966_v32 }
 0xc56   :  { %6968 = vmatprep.subr.bf16.mxu0 %v7802_v3 }
 0xc59   :  { %6970 = vmatpush3.bf16.msra.mxu0 %v7976_v35 }
 0xc5a   :  { %6971 = vmatprep.subr.bf16.mxu0 %v7802_v3 }
 0xc5d   :  { %6973 = vmatpush3.bf16.msra.mxu0 %v7985_v38 }
 0xc5e   :  { %7010 = vmatprep.subr.bf16.mxu0 %v7802_v3 }
 0xd13   :  { %v1182_v1 = vpop.f32.mrb[12].mxu0 }
 0xd14   :  { %v1183_v2 = vadd.f32 %v7993_v39, %v1182_v1  ;;  %v5570_v5 = vpop.f32.mrb[13].mxu0 }
 0xd16   :  { %7716 = vtanh.f32 %v1183_v2 }
 0xd20   :  { %v7717_v8 = vpop.eup %7716 }
 0xd21   :  { %5604 = vmatmul.mubr.f32.vlgmr.msra.gmra.mrb[14].mxu0 %v7717_v8 }
 0xd22   :  { %7012 = vmatpush3.bf16.msra.mxu0 %v7857_v4  ;;  %5676 = vmatprep.mubr.msk.f32.mxu0 %vm7803_vm0, %v7804_v6 }
 0xd23   :  { %7013 = vmatprep.subr.bf16.mxu0 %v7802_v3 }
 0xd26   :  { %7015 = vmatpush3.bf16.msra.mxu0 %v7868_v7 }
 0xd27   :  { %7016 = vmatprep.subr.bf16.mxu0 %v7802_v3 }
 0xd2a   :  { %7018 = vmatpush3.bf16.msra.mxu0 %v7880_v10 }
 0xd2b   :  { %7019 = vmatprep.subr.bf16.mxu0 %v7802_v3 }
 0xd2e   :  { %7021 = vmatpush3.bf16.msra.mxu0 %v7892_v13 }
 0xd2f   :  { %7022 = vmatprep.subr.bf16.mxu0 %v7802_v3 }
 0xdf4   :  { %v1253_v12 = vpop.f32.mrb[14].mxu0 }
 0xdf5   :  { %v1254_v14 = vadd.f32 %v8012_v44, %v1253_v12  ;;  %v5605_v18 = vpop.f32.mrb[15].mxu0  ;;  %v1856_v12 = vstv %s1851_s10 }
 0xdf7   :  { %v1261_v21 = vadd.f32 %v1260_v15, %v1254_v14 }
 0xdf9   :  { %v1263_v22 = vmul.f32 %v1262_v19, %v1261_v21 }
 0xdfb   :  { %v8266_v24 = vadd.f32 %v1263_v22, %v8122_v31 }
 0xdfd   :  { %5623 = vmatmul.mubr.msk.f32.vlgmr.msra.gmra.mrb[16].mxu1 %vm78_vm1, %v8266_v24 }
 0xdfe   :  { %6988 = vmatpush3.bf16.msra.mxu1 %v7909_v17  ;;  %5657 = vmatprep.mubr.msk.f32.mxu1 %vm7803_vm0, %v7804_v6 }
 0xdff   :  { %6989 = vmatprep.subr.bf16.mxu1 %v7802_v3 }
 0xe02   :  { %6991 = vmatpush3.bf16.msra.mxu1 %v7923_v20 }
 0xe03   :  { %6992 = vmatprep.subr.bf16.mxu1 %v7802_v3 }
 0xe06   :  { %6994 = vmatpush3.bf16.msra.mxu1 %v7935_v23 }
 0xe07   :  { %6995 = vmatprep.subr.bf16.mxu1 %v7802_v3 }
 0xe0a   :  { %6997 = vmatpush3.bf16.msra.mxu1 %v7945_v26 }
 0xe0b   :  { %6998 = vmatprep.subr.bf16.mxu1 %v7802_v3 }
 0xe0e   :  { %7000 = vmatpush3.bf16.msra.mxu1 %v7955_v29 }
 0xe0f   :  { %7001 = vmatprep.subr.bf16.mxu1 %v7802_v3 }
 0xe12   :  { %7003 = vmatpush3.bf16.msra.mxu1 %v7966_v32 }
 0xe13   :  { %7004 = vmatprep.subr.bf16.mxu1 %v7802_v3 }
 0xe16   :  { %7006 = vmatpush3.bf16.msra.mxu1 %v7976_v35 }
 0xe17   :  { %7007 = vmatprep.subr.bf16.mxu1 %v7802_v3 }
 0xe1a   :  { %7009 = vmatpush3.bf16.msra.mxu1 %v7985_v38 }
 0xe1b   :  { %7046 = vmatprep.subr.bf16.mxu1 %v7802_v3 }
 0xed0   :  { %v1336_v25 = vpop.f32.mrb[16].mxu1 }
 0xed1   :  { %v1337_v27 = vadd.f32 %v7993_v39, %v1336_v25  ;;  %v5624_v28 = vpop.f32.mrb[17].mxu1 }
 0xed3   :  { %7718 = vtanh.f32 %v1337_v27  ;;  %v2005_v27 = vstv %s1860_s12 }
 0xedd   :  { %v7719_v30 = vpop.eup %7718 }
 0xede   :  { %5658 = vmatmul.mubr.f32.vlgmr.msra.gmra.mrb[18].mxu1 %v7719_v30 }
 0xedf   :  { %7048 = vmatpush3.bf16.msra.mxu1 %v7857_v4  ;;  %5730 = vmatprep.mubr.msk.f32.mxu1 %vm7803_vm0, %v7804_v6 }
 0xee0   :  { %7049 = vmatprep.subr.bf16.mxu1 %v7802_v3 }
 0xee3   :  { %7051 = vmatpush3.bf16.msra.mxu1 %v7868_v7 }
 0xee4   :  { %7052 = vmatprep.subr.bf16.mxu1 %v7802_v3 }
 0xee7   :  { %7054 = vmatpush3.bf16.msra.mxu1 %v7880_v10 }
 0xee8   :  { %7055 = vmatprep.subr.bf16.mxu1 %v7802_v3 }
 0xeeb   :  { %7057 = vmatpush3.bf16.msra.mxu1 %v7892_v13 }
 0xeec   :  { %7058 = vmatprep.subr.bf16.mxu1 %v7802_v3 }
 0xfb1   :  { %v1407_v16 = vpop.f32.mrb[18].mxu1 }
 0xfb2   :  { %v8303_v34 = vadd.f32 %v8012_v44, %v1407_v16  ;;  %v5659_v36 = vpop.f32.mrb[19].mxu1 }
 0xfb4   :  { %v1412_v37 = vmul.f32 %v1411_v33, %v8303_v34 }
 0xfb6   :  { %v1413_v40 = vadd.f32 %v1412_v37, %v8266_v24 }
 0xfb8   :  { %5677 = vmatmul.mubr.msk.f32.vlgmr.msra.gmra.mrb[16].mxu0 %vm78_vm1, %v1413_v40 }
 0xfb9   :  { %7024 = vmatpush3.bf16.msra.mxu0 %v7909_v17  ;;  %5711 = vmatprep.mubr.msk.f32.mxu0 %vm7803_vm0, %v7804_v6 }
 0xfba   :  { %7025 = vmatprep.subr.bf16.mxu0 %v7802_v3 }
 0xfbd   :  { %7027 = vmatpush3.bf16.msra.mxu0 %v7923_v20 }
 0xfbe   :  { %7028 = vmatprep.subr.bf16.mxu0 %v7802_v3 }
 0xfc1   :  { %7030 = vmatpush3.bf16.msra.mxu0 %v7935_v23 }
 0xfc2   :  { %7031 = vmatprep.subr.bf16.mxu0 %v7802_v3 }
 0xfc5   :  { %7033 = vmatpush3.bf16.msra.mxu0 %v7945_v26 }
 0xfc6   :  { %7034 = vmatprep.subr.bf16.mxu0 %v7802_v3 }
 0xfc9   :  { %7036 = vmatpush3.bf16.msra.mxu0 %v7955_v29 }
 0xfca   :  { %7037 = vmatprep.subr.bf16.mxu0 %v7802_v3 }
 0xfcd   :  { %7039 = vmatpush3.bf16.msra.mxu0 %v7966_v32 }
 0xfce   :  { %7040 = vmatprep.subr.bf16.mxu0 %v7802_v3 }
 0xfd1   :  { %7042 = vmatpush3.bf16.msra.mxu0 %v7976_v35 }
 0xfd2   :  { %7043 = vmatprep.subr.bf16.mxu0 %v7802_v3 }
 0xfd5   :  { %7045 = vmatpush3.bf16.msra.mxu0 %v7985_v38 }
 0xfd6   :  { %7082 = vmatprep.subr.bf16.mxu0 %v7802_v3 }
0x108b   :  { %v1483_v41 = vpop.f32.mrb[16].mxu0 }
0x108c   :  { %v1484_v42 = vadd.f32 %v7993_v39, %v1483_v41  ;;  %v5678_v43 = vpop.f32.mrb[17].mxu0 }
0x108e   :  { %7720 = vtanh.f32 %v1484_v42  ;;  %v8489_v42 = vld [vmem:[%s9008_s5] ss:$0 sm:$0xff] }
0x1098   :  { %v7721_v45 = vpop.eup %7720 }
0x1099   :  { %5712 = vmatmul.mubr.f32.vlgmr.msra.gmra.mrb[18].mxu0 %v7721_v45 }
0x109a   :  { %7084 = vmatpush3.bf16.msra.mxu0 %v7857_v4  ;;  %5784 = vmatprep.mubr.msk.f32.mxu0 %vm7803_vm0, %v7804_v6 }
0x109b   :  { %7085 = vmatprep.subr.bf16.mxu0 %v7802_v3 }
0x109e   :  { %7087 = vmatpush3.bf16.msra.mxu0 %v7868_v7 }
0x109f   :  { %7088 = vmatprep.subr.bf16.mxu0 %v7802_v3 }
0x10a2   :  { %7090 = vmatpush3.bf16.msra.mxu0 %v7880_v10 }
0x10a3   :  { %7091 = vmatprep.subr.bf16.mxu0 %v7802_v3 }
0x10a6   :  { %7093 = vmatpush3.bf16.msra.mxu0 %v7892_v13 }
0x10a7   :  { %7094 = vmatprep.subr.bf16.mxu0 %v7802_v3 }
0x116c   :  { %v1554_v46 = vpop.f32.mrb[18].mxu0 }
0x116d   :  { %v8338_v47 = vadd.f32 %v8012_v44, %v1554_v46  ;;  %v5713_v48 = vpop.f32.mrb[19].mxu0 }
0x116f   :  { %v1558_v49 = vmul.f32 %v8338_v47, %v1411_v33 }
0x1171   :  { %v1559_v50 = vadd.f32 %v1558_v49, %v8266_v24 }
0x1173   :  { %5731 = vmatmul.mubr.msk.f32.vlgmr.msra.gmra.mrb[20].mxu1 %vm78_vm1, %v1559_v50 }
0x1174   :  { %7060 = vmatpush3.bf16.msra.mxu1 %v7909_v17  ;;  %5765 = vmatprep.mubr.msk.f32.mxu1 %vm7803_vm0, %v7804_v6 }
0x1175   :  { %7061 = vmatprep.subr.bf16.mxu1 %v7802_v3 }
0x1178   :  { %7063 = vmatpush3.bf16.msra.mxu1 %v7923_v20 }
0x1179   :  { %7064 = vmatprep.subr.bf16.mxu1 %v7802_v3 }
0x117c   :  { %7066 = vmatpush3.bf16.msra.mxu1 %v7935_v23 }
0x117d   :  { %7067 = vmatprep.subr.bf16.mxu1 %v7802_v3 }
0x1180   :  { %7069 = vmatpush3.bf16.msra.mxu1 %v7945_v26 }
0x1181   :  { %7070 = vmatprep.subr.bf16.mxu1 %v7802_v3 }
0x1184   :  { %7072 = vmatpush3.bf16.msra.mxu1 %v7955_v29 }
0x1185   :  { %7073 = vmatprep.subr.bf16.mxu1 %v7802_v3 }
0x1188   :  { %7075 = vmatpush3.bf16.msra.mxu1 %v7966_v32 }
0x1189   :  { %7076 = vmatprep.subr.bf16.mxu1 %v7802_v3 }
0x118c   :  { %7078 = vmatpush3.bf16.msra.mxu1 %v7976_v35 }
0x118d   :  { %7079 = vmatprep.subr.bf16.mxu1 %v7802_v3 }
0x1190   :  { %7081 = vmatpush3.bf16.msra.mxu1 %v7985_v38 }
0x1191   :  { %7118 = vmatprep.subr.bf16.mxu1 %v7802_v3 }
0x1246   :  { %v1629_v51 = vpop.f32.mrb[20].mxu1 }
0x1247   :  { %v1630_v52 = vadd.f32 %v7993_v39, %v1629_v51  ;;  %v5732_v53 = vpop.f32.mrb[21].mxu1 }
0x1248   :  { %v2298_v53 = vstv %s8443_s11 }
0x1249   :  { %7722 = vtanh.f32 %v1630_v52 }
0x1253   :  { %v7723_v54 = vpop.eup %7722 }
0x1254   :  { %5766 = vmatmul.mubr.f32.vlgmr.msra.gmra.mrb[22].mxu1 %v7723_v54 }
0x1255   :  { %7120 = vmatpush3.bf16.msra.mxu1 %v7857_v4  ;;  %5838 = vmatprep.mubr.msk.f32.mxu1 %vm7803_vm0, %v7804_v6 }
0x1256   :  { %7121 = vmatprep.subr.bf16.mxu1 %v7802_v3 }
0x1259   :  { %7123 = vmatpush3.bf16.msra.mxu1 %v7868_v7 }
0x125a   :  { %7124 = vmatprep.subr.bf16.mxu1 %v7802_v3 }
0x125d   :  { %7126 = vmatpush3.bf16.msra.mxu1 %v7880_v10 }
0x125e   :  { %7127 = vmatprep.subr.bf16.mxu1 %v7802_v3 }
0x1261   :  { %7129 = vmatpush3.bf16.msra.mxu1 %v7892_v13 }
0x1262   :  { %7130 = vmatprep.subr.bf16.mxu1 %v7802_v3 }
0x1327   :  { %v1700_v55 = vpop.f32.mrb[22].mxu1 }
0x1328   :  { %v1701_v57 = vadd.f32 %v8012_v44, %v1700_v55  ;;  %v5767_v58 = vpop.f32.mrb[23].mxu1 }
0x132a   :  { %v1705_v59 = vmul.f32 %v1704_v56, %v1701_v57  ;;  %v1852_v1 = vadd.f32 %v1701_v57, %v8338_v47 }
0x132c   :  { %v1706_v60 = vadd.f32 %v1705_v59, %v8266_v24  ;;  %v1853_v2 = vmul.f32 2.0, %v1852_v1 }
0x132e   :  { %5785 = vmatmul.mubr.msk.f32.vlgmr.msra.gmra.mrb[20].mxu0 %vm78_vm1, %v1706_v60  ;;  %v1854_v9 = vadd.f32 %v1853_v2, %v8303_v34  ;;  %v8473_v34 = vld [vmem:[%s9006_s3] ss:$0 sm:$0xff] }
0x132f   :  { %7096 = vmatpush3.bf16.msra.mxu0 %v7909_v17  ;;  %5819 = vmatprep.mubr.msk.f32.mxu0 %vm7803_vm0, %v7804_v6 }
0x1330   :  { %7097 = vmatprep.subr.bf16.mxu0 %v7802_v3 }
0x1333   :  { %7099 = vmatpush3.bf16.msra.mxu0 %v7923_v20 }
0x1334   :  { %7100 = vmatprep.subr.bf16.mxu0 %v7802_v3 }
0x1337   :  { %7102 = vmatpush3.bf16.msra.mxu0 %v7935_v23 }
0x1338   :  { %7103 = vmatprep.subr.bf16.mxu0 %v7802_v3 }
0x133b   :  { %7105 = vmatpush3.bf16.msra.mxu0 %v7945_v26 }
0x133c   :  { %7106 = vmatprep.subr.bf16.mxu0 %v7802_v3 }
0x133f   :  { %7108 = vmatpush3.bf16.msra.mxu0 %v7955_v29 }
0x1340   :  { %7109 = vmatprep.subr.bf16.mxu0 %v7802_v3 }
0x1343   :  { %7111 = vmatpush3.bf16.msra.mxu0 %v7966_v32 }
0x1344   :  { %7112 = vmatprep.subr.bf16.mxu0 %v7802_v3 }
0x1347   :  { %7114 = vmatpush3.bf16.msra.mxu0 %v7976_v35 }
0x1348   :  { %7115 = vmatprep.subr.bf16.mxu0 %v7802_v3 }
0x134b   :  { %7117 = vmatpush3.bf16.msra.mxu0 %v7985_v38 }
0x134c   :  { %7154 = vmatprep.subr.bf16.mxu0 %v7802_v3 }
0x1401   :  { %v1776_v61 = vpop.f32.mrb[20].mxu0 }
0x1402   :  { %v1777_v62 = vadd.f32 %v7993_v39, %v1776_v61  ;;  %v5786_v63 = vpop.f32.mrb[21].mxu0 }
0x1404   :  { %7724 = vtanh.f32 %v1777_v62 }
0x140e   :  { %v7725_v0 = vpop.eup %7724 }
0x140f   :  { %5820 = vmatmul.mubr.f32.vlgmr.msra.gmra.mrb[22].mxu0 %v7725_v0 }
0x1410   :  { %7156 = vmatpush3.bf16.msra.mxu0 %v7857_v4  ;;  %5892 = vmatprep.mubr.msk.f32.mxu0 %vm7803_vm0, %v7804_v6 }
0x1411   :  { %7157 = vmatprep.subr.bf16.mxu0 %v7802_v3 }
0x1414   :  { %7159 = vmatpush3.bf16.msra.mxu0 %v7868_v7 }
0x1415   :  { %7160 = vmatprep.subr.bf16.mxu0 %v7802_v3 }
0x1418   :  { %7162 = vmatpush3.bf16.msra.mxu0 %v7880_v10 }
0x1419   :  { %7163 = vmatprep.subr.bf16.mxu0 %v7802_v3 }
0x141c   :  { %7165 = vmatpush3.bf16.msra.mxu0 %v7892_v13 }
0x141d   :  { %7166 = vmatprep.subr.bf16.mxu0 %v7802_v3 }
0x14e2   :  { %v1847_v5 = vpop.f32.mrb[22].mxu0 }
0x14e3   :  { %v1848_v8 = vadd.f32 %v8012_v44, %v1847_v5  ;;  %v5821_v11 = vpop.f32.mrb[23].mxu0 }
0x14e5   :  { %v1855_v14 = vadd.f32 %v1854_v9, %v1848_v8  ;;  %v2450_v8 = vstv %s2445_s17 }
0x14e7   :  { %v1857_v15 = vmul.f32 %v1856_v12, %v1855_v14 }
0x14e9   :  { %v8410_v18 = vadd.f32 %v1857_v15, %v8266_v24 }
0x14eb   :  { %5839 = vmatmul.mubr.msk.f32.vlgmr.msra.gmra.mrb[24].mxu1 %vm78_vm1, %v8410_v18 }
0x14ec   :  { %7132 = vmatpush3.bf16.msra.mxu1 %v7909_v17  ;;  %5873 = vmatprep.mubr.msk.f32.mxu1 %vm7803_vm0, %v7804_v6 }
0x14ed   :  { %7133 = vmatprep.subr.bf16.mxu1 %v7802_v3 }
0x14f0   :  { %7135 = vmatpush3.bf16.msra.mxu1 %v7923_v20 }
0x14f1   :  { %7136 = vmatprep.subr.bf16.mxu1 %v7802_v3 }
0x14f4   :  { %7138 = vmatpush3.bf16.msra.mxu1 %v7935_v23 }
0x14f5   :  { %7139 = vmatprep.subr.bf16.mxu1 %v7802_v3 }
0x14f8   :  { %7141 = vmatpush3.bf16.msra.mxu1 %v7945_v26 }
0x14f9   :  { %7142 = vmatprep.subr.bf16.mxu1 %v7802_v3 }
0x14fc   :  { %7144 = vmatpush3.bf16.msra.mxu1 %v7955_v29 }
0x14fd   :  { %7145 = vmatprep.subr.bf16.mxu1 %v7802_v3 }
0x1500   :  { %7147 = vmatpush3.bf16.msra.mxu1 %v7966_v32 }
0x1501   :  { %7148 = vmatprep.subr.bf16.mxu1 %v7802_v3 }
0x1504   :  { %7150 = vmatpush3.bf16.msra.mxu1 %v7976_v35 }
0x1505   :  { %7151 = vmatprep.subr.bf16.mxu1 %v7802_v3 }
0x1508   :  { %7153 = vmatpush3.bf16.msra.mxu1 %v7985_v38 }
0x1509   :  { %7190 = vmatprep.subr.bf16.mxu1 %v7802_v3 }
0x15be   :  { %v1930_v19 = vpop.f32.mrb[24].mxu1 }
0x15bf   :  { %v1931_v21 = vadd.f32 %v7993_v39, %v1930_v19  ;;  %v5840_v22 = vpop.f32.mrb[25].mxu1 }
0x15c1   :  { %7726 = vtanh.f32 %v1931_v21 }
0x15cb   :  { %v7727_v25 = vpop.eup %7726 }
0x15cc   :  { %5874 = vmatmul.mubr.f32.vlgmr.msra.gmra.mrb[26].mxu1 %v7727_v25  ;;  %v2599_v25 = vstv %s2454_s19 }
0x15cd   :  { %7192 = vmatpush3.bf16.msra.mxu1 %v7857_v4  ;;  %5946 = vmatprep.mubr.msk.f32.mxu1 %vm7803_vm0, %v7804_v6 }
0x15ce   :  { %7193 = vmatprep.subr.bf16.mxu1 %v7802_v3 }
0x15d1   :  { %7195 = vmatpush3.bf16.msra.mxu1 %v7868_v7 }
0x15d2   :  { %7196 = vmatprep.subr.bf16.mxu1 %v7802_v3 }
0x15d5   :  { %7198 = vmatpush3.bf16.msra.mxu1 %v7880_v10 }
0x15d6   :  { %7199 = vmatprep.subr.bf16.mxu1 %v7802_v3 }
0x15d9   :  { %7201 = vmatpush3.bf16.msra.mxu1 %v7892_v13 }
0x15da   :  { %7202 = vmatprep.subr.bf16.mxu1 %v7802_v3 }
0x169f   :  { %v2001_v39 = vpop.f32.mrb[26].mxu1 }
0x16a0   :  { %v8447_v28 = vadd.f32 %v8012_v44, %v2001_v39  ;;  %v5875_v30 = vpop.f32.mrb[27].mxu1 }
0x16a2   :  { %v2006_v16 = vmul.f32 %v2005_v27, %v8447_v28 }
0x16a4   :  { %v2007_v33 = vadd.f32 %v2006_v16, %v8410_v18 }
0x16a6   :  { %5893 = vmatmul.mubr.msk.f32.vlgmr.msra.gmra.mrb[24].mxu0 %vm78_vm1, %v2007_v33 }
0x16a7   :  { %7168 = vmatpush3.bf16.msra.mxu0 %v7909_v17  ;;  %5927 = vmatprep.mubr.msk.f32.mxu0 %vm7803_vm0, %v7804_v6 }
0x16a8   :  { %7169 = vmatprep.subr.bf16.mxu0 %v7802_v3 }
0x16ab   :  { %7171 = vmatpush3.bf16.msra.mxu0 %v7923_v20 }
0x16ac   :  { %7172 = vmatprep.subr.bf16.mxu0 %v7802_v3 }
0x16af   :  { %7174 = vmatpush3.bf16.msra.mxu0 %v7935_v23 }
0x16b0   :  { %7175 = vmatprep.subr.bf16.mxu0 %v7802_v3 }
0x16b3   :  { %7177 = vmatpush3.bf16.msra.mxu0 %v7945_v26 }
0x16b4   :  { %7178 = vmatprep.subr.bf16.mxu0 %v7802_v3 }
0x16b7   :  { %7180 = vmatpush3.bf16.msra.mxu0 %v7955_v29 }
0x16b8   :  { %7181 = vmatprep.subr.bf16.mxu0 %v7802_v3 }
0x16bb   :  { %7183 = vmatpush3.bf16.msra.mxu0 %v7966_v32 }
0x16bc   :  { %7184 = vmatprep.subr.bf16.mxu0 %v7802_v3 }
0x16bf   :  { %7186 = vmatpush3.bf16.msra.mxu0 %v7976_v35 }
0x16c0   :  { %7187 = vmatprep.subr.bf16.mxu0 %v7802_v3 }
0x16c3   :  { %7189 = vmatpush3.bf16.msra.mxu0 %v7985_v38 }
0x16c4   :  { %7226 = vmatprep.subr.bf16.mxu0 %v7802_v3 }
0x1779   :  { %v2077_v44 = vpop.f32.mrb[24].mxu0 }
0x177a   :  { %v2078_v36 = vadd.f32 %v8473_v34, %v2077_v44  ;;  %v5894_v37 = vpop.f32.mrb[25].mxu0 }
0x177c   :  { %7728 = vtanh.f32 %v2078_v36 }
0x1786   :  { %v7729_v40 = vpop.eup %7728 }
0x1787   :  { %5928 = vmatmul.mubr.f32.vlgmr.msra.gmra.mrb[26].mxu0 %v7729_v40 }
0x1788   :  { %7228 = vmatpush3.bf16.msra.mxu0 %v7857_v4  ;;  %6000 = vmatprep.mubr.msk.f32.mxu0 %vm7803_vm0, %v7804_v6 }
0x1789   :  { %7229 = vmatprep.subr.bf16.mxu0 %v7802_v3 }
0x178c   :  { %7231 = vmatpush3.bf16.msra.mxu0 %v7868_v7 }
0x178d   :  { %7232 = vmatprep.subr.bf16.mxu0 %v7802_v3 }
0x1790   :  { %7234 = vmatpush3.bf16.msra.mxu0 %v7880_v10 }
0x1791   :  { %7235 = vmatprep.subr.bf16.mxu0 %v7802_v3 }
0x1794   :  { %7237 = vmatpush3.bf16.msra.mxu0 %v7892_v13 }
0x1795   :  { %7238 = vmatprep.subr.bf16.mxu0 %v7802_v3 }
0x185a   :  { %v2148_v41 = vpop.f32.mrb[26].mxu0 }
0x185b   :  { %v8492_v43 = vadd.f32 %v8489_v42, %v2148_v41  ;;  %v5929_v45 = vpop.f32.mrb[27].mxu0 }
0x185d   :  { %v2152_v46 = vmul.f32 %v8492_v43, %v2005_v27 }
0x185f   :  { %v2153_v47 = vadd.f32 %v2152_v46, %v8410_v18 }
0x1861   :  { %5947 = vmatmul.mubr.msk.f32.vlgmr.msra.gmra.mrb[28].mxu1 %vm78_vm1, %v2153_v47 }
0x1862   :  { %7204 = vmatpush3.bf16.msra.mxu1 %v7909_v17  ;;  %5981 = vmatprep.mubr.msk.f32.mxu1 %vm7803_vm0, %v7804_v6 }
0x1863   :  { %7205 = vmatprep.subr.bf16.mxu1 %v7802_v3 }
0x1866   :  { %7207 = vmatpush3.bf16.msra.mxu1 %v7923_v20 }
0x1867   :  { %7208 = vmatprep.subr.bf16.mxu1 %v7802_v3 }
0x186a   :  { %7210 = vmatpush3.bf16.msra.mxu1 %v7935_v23 }
0x186b   :  { %7211 = vmatprep.subr.bf16.mxu1 %v7802_v3 }
0x186e   :  { %7213 = vmatpush3.bf16.msra.mxu1 %v7945_v26 }
0x186f   :  { %7214 = vmatprep.subr.bf16.mxu1 %v7802_v3 }
0x1872   :  { %7216 = vmatpush3.bf16.msra.mxu1 %v7955_v29 }
0x1873   :  { %7217 = vmatprep.subr.bf16.mxu1 %v7802_v3 }
0x1876   :  { %7219 = vmatpush3.bf16.msra.mxu1 %v7966_v32 }
0x1877   :  { %7220 = vmatprep.subr.bf16.mxu1 %v7802_v3 }
0x187a   :  { %7222 = vmatpush3.bf16.msra.mxu1 %v7976_v35 }
0x187b   :  { %7223 = vmatprep.subr.bf16.mxu1 %v7802_v3 }
0x187e   :  { %7225 = vmatpush3.bf16.msra.mxu1 %v7985_v38 }
0x187f   :  { %7262 = vmatprep.subr.bf16.mxu1 %v7802_v3 }
0x1934   :  { %v2223_v48 = vpop.f32.mrb[28].mxu1 }
0x1935   :  { %v2224_v49 = vadd.f32 %v8473_v34, %v2223_v48  ;;  %v5948_v50 = vpop.f32.mrb[29].mxu1 }
0x1937   :  { %7730 = vtanh.f32 %v2224_v49 }
0x1941   :  { %v7731_v51 = vpop.eup %7730 }
0x1942   :  { %5982 = vmatmul.mubr.f32.vlgmr.msra.gmra.mrb[30].mxu1 %v7731_v51  ;;  %v2892_v51 = vstv %s8597_s18 }
0x1943   :  { %7264 = vmatpush3.bf16.msra.mxu1 %v7857_v4  ;;  %6054 = vmatprep.mubr.msk.f32.mxu1 %vm7803_vm0, %v7804_v6 }
0x1944   :  { %7265 = vmatprep.subr.bf16.mxu1 %v7802_v3 }
0x1947   :  { %7267 = vmatpush3.bf16.msra.mxu1 %v7868_v7 }
0x1948   :  { %7268 = vmatprep.subr.bf16.mxu1 %v7802_v3 }
0x194b   :  { %7270 = vmatpush3.bf16.msra.mxu1 %v7880_v10 }
0x194c   :  { %7271 = vmatprep.subr.bf16.mxu1 %v7802_v3 }
0x194f   :  { %7273 = vmatpush3.bf16.msra.mxu1 %v7892_v13 }
0x1950   :  { %7274 = vmatprep.subr.bf16.mxu1 %v7802_v3 }
0x1a15   :  { %v2294_v52 = vpop.f32.mrb[30].mxu1 }
0x1a16   :  { %v2295_v54 = vadd.f32 %v8489_v42, %v2294_v52  ;;  %v5983_v55 = vpop.f32.mrb[31].mxu1 }
0x1a18   :  { %v2299_v56 = vmul.f32 %v2298_v53, %v2295_v54  ;;  %v2446_v62 = vadd.f32 %v2295_v54, %v8492_v43 }
0x1a1a   :  { %v2300_v57 = vadd.f32 %v2299_v56, %v8410_v18  ;;  %v2447_v63 = vmul.f32 2.0, %v2446_v62 }
0x1a1c   :  { %6001 = vmatmul.mubr.msk.f32.vlgmr.msra.gmra.mrb[28].mxu0 %vm78_vm1, %v2300_v57  ;;  %v2448_v2 = vadd.f32 %v2447_v63, %v8447_v28 }
0x1a1d   :  { %7240 = vmatpush3.bf16.msra.mxu0 %v7909_v17  ;;  %6035 = vmatprep.mubr.msk.f32.mxu0 %vm7803_vm0, %v7804_v6 }
0x1a1e   :  { %7241 = vmatprep.subr.bf16.mxu0 %v7802_v3 }
0x1a21   :  { %7243 = vmatpush3.bf16.msra.mxu0 %v7923_v20 }
0x1a22   :  { %7244 = vmatprep.subr.bf16.mxu0 %v7802_v3 }
0x1a25   :  { %7246 = vmatpush3.bf16.msra.mxu0 %v7935_v23 }
0x1a26   :  { %7247 = vmatprep.subr.bf16.mxu0 %v7802_v3 }
0x1a29   :  { %7249 = vmatpush3.bf16.msra.mxu0 %v7945_v26 }
0x1a2a   :  { %7250 = vmatprep.subr.bf16.mxu0 %v7802_v3 }
0x1a2d   :  { %7252 = vmatpush3.bf16.msra.mxu0 %v7955_v29 }
0x1a2e   :  { %7253 = vmatprep.subr.bf16.mxu0 %v7802_v3 }
0x1a31   :  { %7255 = vmatpush3.bf16.msra.mxu0 %v7966_v32 }
0x1a32   :  { %7256 = vmatprep.subr.bf16.mxu0 %v7802_v3 }
0x1a35   :  { %7258 = vmatpush3.bf16.msra.mxu0 %v7976_v35 }
0x1a36   :  { %7259 = vmatprep.subr.bf16.mxu0 %v7802_v3 }
0x1a39   :  { %7261 = vmatpush3.bf16.msra.mxu0 %v7985_v38 }
0x1a3a   :  { %7298 = vmatprep.subr.bf16.mxu0 %v7802_v3 }
0x1aef   :  { %v2370_v58 = vpop.f32.mrb[28].mxu0 }
0x1af0   :  { %v2371_v59 = vadd.f32 %v8473_v34, %v2370_v58  ;;  %v6002_v60 = vpop.f32.mrb[29].mxu0 }
0x1af2   :  { %7732 = vtanh.f32 %v2371_v59 }
0x1afc   :  { %v7733_v61 = vpop.eup %7732 }
0x1afd   :  { %6036 = vmatmul.mubr.f32.vlgmr.msra.gmra.mrb[30].mxu0 %v7733_v61 }
0x1afe   :  { %7300 = vmatpush3.bf16.msra.mxu0 %v7857_v4  ;;  %6108 = vmatprep.mubr.msk.f32.mxu0 %vm7803_vm0, %v7804_v6 }
0x1aff   :  { %7301 = vmatprep.subr.bf16.mxu0 %v7802_v3 }
0x1b02   :  { %7303 = vmatpush3.bf16.msra.mxu0 %v7868_v7 }
0x1b03   :  { %7304 = vmatprep.subr.bf16.mxu0 %v7802_v3 }
0x1b06   :  { %7306 = vmatpush3.bf16.msra.mxu0 %v7880_v10 }
0x1b07   :  { %7307 = vmatprep.subr.bf16.mxu0 %v7802_v3 }
0x1b0a   :  { %7309 = vmatpush3.bf16.msra.mxu0 %v7892_v13 }
0x1b0b   :  { %7310 = vmatprep.subr.bf16.mxu0 %v7802_v3 }
0x1bd0   :  { %v2441_v0 = vpop.f32.mrb[30].mxu0 }
0x1bd1   :  { %v2442_v1 = vadd.f32 %v8489_v42, %v2441_v0  ;;  %v6037_v5 = vpop.f32.mrb[31].mxu0 }
0x1bd3   :  { %v2449_v9 = vadd.f32 %v2448_v2, %v2442_v1  ;;  %v3044_v2 = vstv %s3039_s20 }
0x1bd5   :  { %v2451_v11 = vmul.f32 %v2450_v8, %v2449_v9 }
0x1bd7   :  { %v8564_v12 = vadd.f32 %v2451_v11, %v8410_v18 }
0x1bd9   :  { %6055 = vmatmul.mubr.msk.f32.vlgmr.msra.gmra.mrb[32].mxu1 %vm78_vm1, %v8564_v12 }
0x1bda   :  { %7276 = vmatpush3.bf16.msra.mxu1 %v7909_v17  ;;  %6089 = vmatprep.mubr.msk.f32.mxu1 %vm7803_vm0, %v7804_v6 }
0x1bdb   :  { %7277 = vmatprep.subr.bf16.mxu1 %v7802_v3 }
0x1bde   :  { %7279 = vmatpush3.bf16.msra.mxu1 %v7923_v20 }
0x1bdf   :  { %7280 = vmatprep.subr.bf16.mxu1 %v7802_v3 }
0x1be2   :  { %7282 = vmatpush3.bf16.msra.mxu1 %v7935_v23 }
0x1be3   :  { %7283 = vmatprep.subr.bf16.mxu1 %v7802_v3 }
0x1be6   :  { %7285 = vmatpush3.bf16.msra.mxu1 %v7945_v26 }
0x1be7   :  { %7286 = vmatprep.subr.bf16.mxu1 %v7802_v3 }
0x1bea   :  { %7288 = vmatpush3.bf16.msra.mxu1 %v7955_v29 }
0x1beb   :  { %7289 = vmatprep.subr.bf16.mxu1 %v7802_v3 }
0x1bee   :  { %7291 = vmatpush3.bf16.msra.mxu1 %v7966_v32 }
0x1bef   :  { %7292 = vmatprep.subr.bf16.mxu1 %v7802_v3 }
0x1bf2   :  { %7294 = vmatpush3.bf16.msra.mxu1 %v7976_v35 }
0x1bf3   :  { %7295 = vmatprep.subr.bf16.mxu1 %v7802_v3 }
0x1bf6   :  { %7297 = vmatpush3.bf16.msra.mxu1 %v7985_v38 }
0x1bf7   :  { %7334 = vmatprep.subr.bf16.mxu1 %v7802_v3 }
0x1cac   :  { %v2524_v14 = vpop.f32.mrb[32].mxu1 }
0x1cad   :  { %v2525_v15 = vadd.f32 %v8473_v34, %v2524_v14  ;;  %v6056_v19 = vpop.f32.mrb[33].mxu1 }
0x1caf   :  { %7734 = vtanh.f32 %v2525_v15 }
0x1cb9   :  { %v7735_v21 = vpop.eup %7734 }
0x1cba   :  { %6090 = vmatmul.mubr.f32.vlgmr.msra.gmra.mrb[34].mxu1 %v7735_v21 }
0x1cbb   :  { %7336 = vmatpush3.bf16.msra.mxu1 %v7857_v4  ;;  %6162 = vmatprep.mubr.msk.f32.mxu1 %vm7803_vm0, %v7804_v6 }
0x1cbc   :  { %7337 = vmatprep.subr.bf16.mxu1 %v7802_v3 }
0x1cbf   :  { %7339 = vmatpush3.bf16.msra.mxu1 %v7868_v7 }
0x1cc0   :  { %7340 = vmatprep.subr.bf16.mxu1 %v7802_v3 }
0x1cc3   :  { %7342 = vmatpush3.bf16.msra.mxu1 %v7880_v10 }
0x1cc4   :  { %7343 = vmatprep.subr.bf16.mxu1 %v7802_v3 }
0x1cc7   :  { %7345 = vmatpush3.bf16.msra.mxu1 %v7892_v13 }
0x1cc8   :  { %7346 = vmatprep.subr.bf16.mxu1 %v7802_v3 }
0x1d8d   :  { %v2595_v22 = vpop.f32.mrb[34].mxu1 }
0x1d8e   :  { %v8601_v39 = vadd.f32 %v8489_v42, %v2595_v22  ;;  %v6091_v27 = vpop.f32.mrb[35].mxu1  ;;  %v3193_v22 = vstv %s3048_s21 }
0x1d90   :  { %v2600_v28 = vmul.f32 %v2599_v25, %v8601_v39 }
0x1d92   :  { %v2601_v30 = vadd.f32 %v2600_v28, %v8564_v12 }
0x1d94   :  { %6109 = vmatmul.mubr.msk.f32.vlgmr.msra.gmra.mrb[32].mxu0 %vm78_vm1, %v2601_v30 }
0x1d95   :  { %7312 = vmatpush3.bf16.msra.mxu0 %v7909_v17  ;;  %6143 = vmatprep.mubr.msk.f32.mxu0 %vm7803_vm0, %v7804_v6 }
0x1d96   :  { %7313 = vmatprep.subr.bf16.mxu0 %v7802_v3 }
0x1d99   :  { %7315 = vmatpush3.bf16.msra.mxu0 %v7923_v20 }
0x1d9a   :  { %7316 = vmatprep.subr.bf16.mxu0 %v7802_v3 }
0x1d9d   :  { %7318 = vmatpush3.bf16.msra.mxu0 %v7935_v23 }
0x1d9e   :  { %7319 = vmatprep.subr.bf16.mxu0 %v7802_v3 }
0x1da1   :  { %7321 = vmatpush3.bf16.msra.mxu0 %v7945_v26 }
0x1da2   :  { %7322 = vmatprep.subr.bf16.mxu0 %v7802_v3 }
0x1da5   :  { %7324 = vmatpush3.bf16.msra.mxu0 %v7955_v29 }
0x1da6   :  { %7325 = vmatprep.subr.bf16.mxu0 %v7802_v3 }
0x1da9   :  { %7327 = vmatpush3.bf16.msra.mxu0 %v7966_v32 }
0x1daa   :  { %7328 = vmatprep.subr.bf16.mxu0 %v7802_v3 }
0x1dad   :  { %7330 = vmatpush3.bf16.msra.mxu0 %v7976_v35 }
0x1dae   :  { %7331 = vmatprep.subr.bf16.mxu0 %v7802_v3 }
0x1db1   :  { %7333 = vmatpush3.bf16.msra.mxu0 %v7985_v38 }
0x1db2   :  { %7370 = vmatprep.subr.bf16.mxu0 %v7802_v3 }
0x1e67   :  { %v2671_v16 = vpop.f32.mrb[32].mxu0 }
0x1e68   :  { %v2672_v33 = vadd.f32 %v8473_v34, %v2671_v16  ;;  %v6110_v44 = vpop.f32.mrb[33].mxu0 }
0x1e6a   :  { %7736 = vtanh.f32 %v2672_v33 }
0x1e74   :  { %v7737_v36 = vpop.eup %7736 }
0x1e75   :  { %6144 = vmatmul.mubr.f32.vlgmr.msra.gmra.mrb[34].mxu0 %v7737_v36 }
0x1e76   :  { %7372 = vmatpush3.bf16.msra.mxu0 %v7857_v4  ;;  %6216 = vmatprep.mubr.msk.f32.mxu0 %vm7803_vm0, %v7804_v6 }
0x1e77   :  { %7373 = vmatprep.subr.bf16.mxu0 %v7802_v3 }
0x1e7a   :  { %7375 = vmatpush3.bf16.msra.mxu0 %v7868_v7 }
0x1e7b   :  { %7376 = vmatprep.subr.bf16.mxu0 %v7802_v3 }
0x1e7e   :  { %7378 = vmatpush3.bf16.msra.mxu0 %v7880_v10 }
0x1e7f   :  { %7379 = vmatprep.subr.bf16.mxu0 %v7802_v3 }
0x1e82   :  { %7381 = vmatpush3.bf16.msra.mxu0 %v7892_v13 }
0x1e83   :  { %7382 = vmatprep.subr.bf16.mxu0 %v7802_v3 }
0x1f48   :  { %v2742_v37 = vpop.f32.mrb[34].mxu0 }
0x1f49   :  { %v8636_v40 = vadd.f32 %v8489_v42, %v2742_v37  ;;  %v6145_v41 = vpop.f32.mrb[35].mxu0 }
0x1f4b   :  { %v2746_v43 = vmul.f32 %v8636_v40, %v2599_v25 }
0x1f4d   :  { %v2747_v45 = vadd.f32 %v2746_v43, %v8564_v12 }
0x1f4f   :  { %6163 = vmatmul.mubr.msk.f32.vlgmr.msra.gmra.mrb[36].mxu1 %vm78_vm1, %v2747_v45 }
0x1f50   :  { %7348 = vmatpush3.bf16.msra.mxu1 %v7909_v17  ;;  %6197 = vmatprep.mubr.msk.f32.mxu1 %vm7803_vm0, %v7804_v6 }
0x1f51   :  { %7349 = vmatprep.subr.bf16.mxu1 %v7802_v3 }
0x1f54   :  { %7351 = vmatpush3.bf16.msra.mxu1 %v7923_v20 }
0x1f55   :  { %7352 = vmatprep.subr.bf16.mxu1 %v7802_v3 }
0x1f58   :  { %7354 = vmatpush3.bf16.msra.mxu1 %v7935_v23 }
0x1f59   :  { %7355 = vmatprep.subr.bf16.mxu1 %v7802_v3 }
0x1f5c   :  { %7357 = vmatpush3.bf16.msra.mxu1 %v7945_v26 }
0x1f5d   :  { %7358 = vmatprep.subr.bf16.mxu1 %v7802_v3 }
0x1f60   :  { %7360 = vmatpush3.bf16.msra.mxu1 %v7955_v29 }
0x1f61   :  { %7361 = vmatprep.subr.bf16.mxu1 %v7802_v3 }
0x1f64   :  { %7363 = vmatpush3.bf16.msra.mxu1 %v7966_v32 }
0x1f65   :  { %7364 = vmatprep.subr.bf16.mxu1 %v7802_v3 }
0x1f68   :  { %7366 = vmatpush3.bf16.msra.mxu1 %v7976_v35 }
0x1f69   :  { %7367 = vmatprep.subr.bf16.mxu1 %v7802_v3 }
0x1f6c   :  { %7369 = vmatpush3.bf16.msra.mxu1 %v7985_v38 }
0x1f6d   :  { %7406 = vmatprep.subr.bf16.mxu1 %v7802_v3 }
0x2022   :  { %v2817_v46 = vpop.f32.mrb[36].mxu1 }
0x2023   :  { %v2818_v47 = vadd.f32 %v8473_v34, %v2817_v46  ;;  %v6164_v48 = vpop.f32.mrb[37].mxu1 }
0x2025   :  { %7738 = vtanh.f32 %v2818_v47 }
0x202f   :  { %v7739_v49 = vpop.eup %7738 }
0x2030   :  { %6198 = vmatmul.mubr.f32.vlgmr.msra.gmra.mrb[38].mxu1 %v7739_v49 }
0x2031   :  { %7408 = vmatpush3.bf16.msra.mxu1 %v7857_v4  ;;  %6270 = vmatprep.mubr.msk.f32.mxu1 %vm7803_vm0, %v7804_v6 }
0x2032   :  { %7409 = vmatprep.subr.bf16.mxu1 %v7802_v3 }
0x2035   :  { %7411 = vmatpush3.bf16.msra.mxu1 %v7868_v7 }
0x2036   :  { %7412 = vmatprep.subr.bf16.mxu1 %v7802_v3 }
0x2039   :  { %7414 = vmatpush3.bf16.msra.mxu1 %v7880_v10 }
0x203a   :  { %7415 = vmatprep.subr.bf16.mxu1 %v7802_v3 }
0x203d   :  { %7417 = vmatpush3.bf16.msra.mxu1 %v7892_v13 }
0x203e   :  { %7418 = vmatprep.subr.bf16.mxu1 %v7802_v3 }
0x2103   :  { %v2888_v50 = vpop.f32.mrb[38].mxu1 }
0x2104   :  { %v2889_v52 = vadd.f32 %v8489_v42, %v2888_v50  ;;  %v6199_v53 = vpop.f32.mrb[39].mxu1  ;;  %v3486_v50 = vstv %s8741_s2 }
0x2106   :  { %v2893_v54 = vmul.f32 %v2892_v51, %v2889_v52  ;;  %v3040_v60 = vadd.f32 %v2889_v52, %v8636_v40 }
0x2108   :  { %v2894_v55 = vadd.f32 %v2893_v54, %v8564_v12  ;;  %v3041_v61 = vmul.f32 2.0, %v3040_v60 }
0x210a   :  { %6217 = vmatmul.mubr.msk.f32.vlgmr.msra.gmra.mrb[36].mxu0 %vm78_vm1, %v2894_v55  ;;  %v3042_v0 = vadd.f32 %v3041_v61, %v8601_v39 }
0x210b   :  { %7384 = vmatpush3.bf16.msra.mxu0 %v7909_v17  ;;  %6251 = vmatprep.mubr.msk.f32.mxu0 %vm7803_vm0, %v7804_v6 }
0x210c   :  { %7385 = vmatprep.subr.bf16.mxu0 %v7802_v3 }
0x210f   :  { %7387 = vmatpush3.bf16.msra.mxu0 %v7923_v20 }
0x2110   :  { %7388 = vmatprep.subr.bf16.mxu0 %v7802_v3 }
0x2113   :  { %7390 = vmatpush3.bf16.msra.mxu0 %v7935_v23 }
0x2114   :  { %7391 = vmatprep.subr.bf16.mxu0 %v7802_v3 }
0x2117   :  { %7393 = vmatpush3.bf16.msra.mxu0 %v7945_v26 }
0x2118   :  { %7394 = vmatprep.subr.bf16.mxu0 %v7802_v3 }
0x211b   :  { %7396 = vmatpush3.bf16.msra.mxu0 %v7955_v29 }
0x211c   :  { %7397 = vmatprep.subr.bf16.mxu0 %v7802_v3 }
0x211f   :  { %7399 = vmatpush3.bf16.msra.mxu0 %v7966_v32 }
0x2120   :  { %7400 = vmatprep.subr.bf16.mxu0 %v7802_v3 }
0x2123   :  { %7402 = vmatpush3.bf16.msra.mxu0 %v7976_v35 }
0x2124   :  { %7403 = vmatprep.subr.bf16.mxu0 %v7802_v3 }
0x2127   :  { %7405 = vmatpush3.bf16.msra.mxu0 %v7985_v38 }
0x2128   :  { %7442 = vmatprep.subr.bf16.mxu0 %v7802_v3 }
0x21dd   :  { %v2964_v56 = vpop.f32.mrb[36].mxu0 }
0x21de   :  { %v2965_v57 = vadd.f32 %v8473_v34, %v2964_v56  ;;  %v6218_v58 = vpop.f32.mrb[37].mxu0 }
0x21e0   :  { %7740 = vtanh.f32 %v2965_v57 }
0x21ea   :  { %v7741_v59 = vpop.eup %7740 }
0x21eb   :  { %6252 = vmatmul.mubr.f32.vlgmr.msra.gmra.mrb[38].mxu0 %v7741_v59 }
0x21ec   :  { %7444 = vmatpush3.bf16.msra.mxu0 %v7857_v4  ;;  %6324 = vmatprep.mubr.msk.f32.mxu0 %vm7803_vm0, %v7804_v6 }
0x21ed   :  { %7445 = vmatprep.subr.bf16.mxu0 %v7802_v3 }
0x21f0   :  { %7447 = vmatpush3.bf16.msra.mxu0 %v7868_v7 }
0x21f1   :  { %7448 = vmatprep.subr.bf16.mxu0 %v7802_v3 }
0x21f4   :  { %7450 = vmatpush3.bf16.msra.mxu0 %v7880_v10 }
0x21f5   :  { %7451 = vmatprep.subr.bf16.mxu0 %v7802_v3 }
0x21f8   :  { %7453 = vmatpush3.bf16.msra.mxu0 %v7892_v13 }
0x21f9   :  { %7454 = vmatprep.subr.bf16.mxu0 %v7802_v3 }
0x22be   :  { %v3035_v62 = vpop.f32.mrb[38].mxu0 }
0x22bf   :  { %v3036_v63 = vadd.f32 %v8489_v42, %v3035_v62  ;;  %v6253_v1 = vpop.f32.mrb[39].mxu0 }
0x22c0   :  { %v3638_v1 = vstv %s3633_s22 }
0x22c1   :  { %v3043_v5 = vadd.f32 %v3042_v0, %v3036_v63 }
0x22c3   :  { %v3045_v8 = vmul.f32 %v3044_v2, %v3043_v5 }
0x22c5   :  { %v8708_v9 = vadd.f32 %v3045_v8, %v8564_v12 }
0x22c7   :  { %6271 = vmatmul.mubr.msk.f32.vlgmr.msra.gmra.mrb[40].mxu1 %vm78_vm1, %v8708_v9 }
0x22c8   :  { %7420 = vmatpush3.bf16.msra.mxu1 %v7909_v17  ;;  %6305 = vmatprep.mubr.msk.f32.mxu1 %vm7803_vm0, %v7804_v6 }
0x22c9   :  { %7421 = vmatprep.subr.bf16.mxu1 %v7802_v3 }
0x22cc   :  { %7423 = vmatpush3.bf16.msra.mxu1 %v7923_v20 }
0x22cd   :  { %7424 = vmatprep.subr.bf16.mxu1 %v7802_v3 }
0x22d0   :  { %7426 = vmatpush3.bf16.msra.mxu1 %v7935_v23 }
0x22d1   :  { %7427 = vmatprep.subr.bf16.mxu1 %v7802_v3 }
0x22d4   :  { %7429 = vmatpush3.bf16.msra.mxu1 %v7945_v26 }
0x22d5   :  { %7430 = vmatprep.subr.bf16.mxu1 %v7802_v3 }
0x22d8   :  { %7432 = vmatpush3.bf16.msra.mxu1 %v7955_v29 }
0x22d9   :  { %7433 = vmatprep.subr.bf16.mxu1 %v7802_v3 }
0x22dc   :  { %7435 = vmatpush3.bf16.msra.mxu1 %v7966_v32 }
0x22dd   :  { %7436 = vmatprep.subr.bf16.mxu1 %v7802_v3 }
0x22e0   :  { %7438 = vmatpush3.bf16.msra.mxu1 %v7976_v35 }
0x22e1   :  { %7439 = vmatprep.subr.bf16.mxu1 %v7802_v3 }
0x22e4   :  { %7441 = vmatpush3.bf16.msra.mxu1 %v7985_v38 }
0x22e5   :  { %7478 = vmatprep.subr.bf16.mxu1 %v7802_v3 }
0x239a   :  { %v3118_v11 = vpop.f32.mrb[40].mxu1 }
0x239b   :  { %v3119_v14 = vadd.f32 %v8473_v34, %v3118_v11  ;;  %v6272_v15 = vpop.f32.mrb[41].mxu1 }
0x239d   :  { %7742 = vtanh.f32 %v3119_v14 }
0x23a7   :  { %v7743_v19 = vpop.eup %7742 }
0x23a8   :  { %6306 = vmatmul.mubr.f32.vlgmr.msra.gmra.mrb[42].mxu1 %v7743_v19 }
0x23a9   :  { %7480 = vmatpush3.bf16.msra.mxu1 %v7857_v4  ;;  %6378 = vmatprep.mubr.msk.f32.mxu1 %vm7803_vm0, %v7804_v6 }
0x23aa   :  { %7481 = vmatprep.subr.bf16.mxu1 %v7802_v3 }
0x23ad   :  { %7483 = vmatpush3.bf16.msra.mxu1 %v7868_v7 }
0x23ae   :  { %7484 = vmatprep.subr.bf16.mxu1 %v7802_v3 }
0x23b1   :  { %7486 = vmatpush3.bf16.msra.mxu1 %v7880_v10 }
0x23b2   :  { %7487 = vmatprep.subr.bf16.mxu1 %v7802_v3 }
0x23b5   :  { %7489 = vmatpush3.bf16.msra.mxu1 %v7892_v13 }
0x23b6   :  { %7490 = vmatprep.subr.bf16.mxu1 %v7802_v3 }
0x247b   :  { %v3189_v21 = vpop.f32.mrb[42].mxu1 }
0x247c   :  { %v8745_v25 = vadd.f32 %v8489_v42, %v3189_v21  ;;  %v6307_v39 = vpop.f32.mrb[43].mxu1 }
0x247e   :  { %v3194_v27 = vmul.f32 %v3193_v22, %v8745_v25 }
0x2480   :  { %v3195_v28 = vadd.f32 %v3194_v27, %v8708_v9 }
0x2482   :  { %6325 = vmatmul.mubr.msk.f32.vlgmr.msra.gmra.mrb[40].mxu0 %vm78_vm1, %v3195_v28 }
0x2483   :  { %7456 = vmatpush3.bf16.msra.mxu0 %v7909_v17  ;;  %6359 = vmatprep.mubr.msk.f32.mxu0 %vm7803_vm0, %v7804_v6 }
0x2484   :  { %7457 = vmatprep.subr.bf16.mxu0 %v7802_v3 }
0x2487   :  { %7459 = vmatpush3.bf16.msra.mxu0 %v7923_v20 }
0x2488   :  { %7460 = vmatprep.subr.bf16.mxu0 %v7802_v3 }
0x248b   :  { %7462 = vmatpush3.bf16.msra.mxu0 %v7935_v23 }
0x248c   :  { %7463 = vmatprep.subr.bf16.mxu0 %v7802_v3 }
0x248f   :  { %7465 = vmatpush3.bf16.msra.mxu0 %v7945_v26 }
0x2490   :  { %7466 = vmatprep.subr.bf16.mxu0 %v7802_v3 }
0x2493   :  { %7468 = vmatpush3.bf16.msra.mxu0 %v7955_v29 }
0x2494   :  { %7469 = vmatprep.subr.bf16.mxu0 %v7802_v3 }
0x2497   :  { %7471 = vmatpush3.bf16.msra.mxu0 %v7966_v32 }
0x2498   :  { %7472 = vmatprep.subr.bf16.mxu0 %v7802_v3 }
0x249b   :  { %7474 = vmatpush3.bf16.msra.mxu0 %v7976_v35 }
0x249c   :  { %7475 = vmatprep.subr.bf16.mxu0 %v7802_v3 }
0x249f   :  { %7477 = vmatpush3.bf16.msra.mxu0 %v7985_v38 }
0x24a0   :  { %7514 = vmatprep.subr.bf16.mxu0 %v7802_v3 }
0x2555   :  { %v3265_v30 = vpop.f32.mrb[40].mxu0 }
0x2556   :  { %v3266_v16 = vadd.f32 %v8473_v34, %v3265_v30  ;;  %v6326_v33 = vpop.f32.mrb[41].mxu0 }
0x2558   :  { %7744 = vtanh.f32 %v3266_v16 }
0x2562   :  { %v7745_v44 = vpop.eup %7744 }
0x2563   :  { %6360 = vmatmul.mubr.f32.vlgmr.msra.gmra.mrb[42].mxu0 %v7745_v44 }
0x2564   :  { %7516 = vmatpush3.bf16.msra.mxu0 %v7857_v4  ;;  %6432 = vmatprep.mubr.msk.f32.mxu0 %vm7803_vm0, %v7804_v6 }
0x2565   :  { %7517 = vmatprep.subr.bf16.mxu0 %v7802_v3 }
0x2568   :  { %7519 = vmatpush3.bf16.msra.mxu0 %v7868_v7 }
0x2569   :  { %7520 = vmatprep.subr.bf16.mxu0 %v7802_v3 }
0x256c   :  { %7522 = vmatpush3.bf16.msra.mxu0 %v7880_v10 }
0x256d   :  { %7523 = vmatprep.subr.bf16.mxu0 %v7802_v3 }
0x2570   :  { %7525 = vmatpush3.bf16.msra.mxu0 %v7892_v13 }
0x2571   :  { %7526 = vmatprep.subr.bf16.mxu0 %v7802_v3 }
0x2636   :  { %v3336_v36 = vpop.f32.mrb[42].mxu0 }
0x2637   :  { %v8780_v37 = vadd.f32 %v8489_v42, %v3336_v36  ;;  %v6361_v40 = vpop.f32.mrb[43].mxu0 }
0x2639   :  { %v3340_v41 = vmul.f32 %v8780_v37, %v3193_v22  ;;  %v3787_v22 = vstv %s3642_s24 }
0x263b   :  { %v3341_v43 = vadd.f32 %v3340_v41, %v8708_v9 }
0x263d   :  { %6379 = vmatmul.mubr.msk.f32.vlgmr.msra.gmra.mrb[44].mxu1 %vm78_vm1, %v3341_v43 }
0x263e   :  { %7492 = vmatpush3.bf16.msra.mxu1 %v7909_v17  ;;  %6413 = vmatprep.mubr.msk.f32.mxu1 %vm7803_vm0, %v7804_v6 }
0x263f   :  { %7493 = vmatprep.subr.bf16.mxu1 %v7802_v3 }
0x2642   :  { %7495 = vmatpush3.bf16.msra.mxu1 %v7923_v20 }
0x2643   :  { %7496 = vmatprep.subr.bf16.mxu1 %v7802_v3 }
0x2646   :  { %7498 = vmatpush3.bf16.msra.mxu1 %v7935_v23 }
0x2647   :  { %7499 = vmatprep.subr.bf16.mxu1 %v7802_v3 }
0x264a   :  { %7501 = vmatpush3.bf16.msra.mxu1 %v7945_v26 }
0x264b   :  { %7502 = vmatprep.subr.bf16.mxu1 %v7802_v3 }
0x264e   :  { %7504 = vmatpush3.bf16.msra.mxu1 %v7955_v29 }
0x264f   :  { %7505 = vmatprep.subr.bf16.mxu1 %v7802_v3 }
0x2652   :  { %7507 = vmatpush3.bf16.msra.mxu1 %v7966_v32 }
0x2653   :  { %7508 = vmatprep.subr.bf16.mxu1 %v7802_v3 }
0x2656   :  { %7510 = vmatpush3.bf16.msra.mxu1 %v7976_v35 }
0x2657   :  { %7511 = vmatprep.subr.bf16.mxu1 %v7802_v3 }
0x265a   :  { %7513 = vmatpush3.bf16.msra.mxu1 %v7985_v38 }
0x265b   :  { %7550 = vmatprep.subr.bf16.mxu1 %v7802_v3 }
0x2710   :  { %v3411_v45 = vpop.f32.mrb[44].mxu1 }
0x2711   :  { %v3412_v46 = vadd.f32 %v8473_v34, %v3411_v45  ;;  %v6380_v47 = vpop.f32.mrb[45].mxu1  ;;  %v4080_v45 = vstv %s8885_s23 }
0x2713   :  { %7746 = vtanh.f32 %v3412_v46  ;;  %v7761_v46 = vld [vmem:[%s9008_s5] ss:$0 sm:$0xff] }
0x271d   :  { %v7747_v48 = vpop.eup %7746 }
0x271e   :  { %6414 = vmatmul.mubr.f32.vlgmr.msra.gmra.mrb[46].mxu1 %v7747_v48 }
0x271f   :  { %7552 = vmatpush3.bf16.msra.mxu1 %v7857_v4  ;;  %6486 = vmatprep.mubr.msk.f32.mxu1 %vm7803_vm0, %v7804_v6 }
0x2720   :  { %7553 = vmatprep.subr.bf16.mxu1 %v7802_v3 }
0x2723   :  { %7555 = vmatpush3.bf16.msra.mxu1 %v7868_v7 }
0x2724   :  { %7556 = vmatprep.subr.bf16.mxu1 %v7802_v3 }
0x2727   :  { %7558 = vmatpush3.bf16.msra.mxu1 %v7880_v10 }
0x2728   :  { %7559 = vmatprep.subr.bf16.mxu1 %v7802_v3 }
0x272b   :  { %7561 = vmatpush3.bf16.msra.mxu1 %v7892_v13 }
0x272c   :  { %7562 = vmatprep.subr.bf16.mxu1 %v7802_v3 }
0x27f1   :  { %v3482_v49 = vpop.f32.mrb[46].mxu1 }
0x27f2   :  { %v3483_v51 = vadd.f32 %v8489_v42, %v3482_v49  ;;  %v6415_v52 = vpop.f32.mrb[47].mxu1 }
0x27f3   :  { %v4240_v52 = vlaneseq }
0x27f4   :  { %v3487_v53 = vmul.f32 %v3486_v50, %v3483_v51  ;;  %v3634_v59 = vadd.f32 %v3483_v51, %v8780_v37 }
0x27f6   :  { %v3488_v54 = vadd.f32 %v3487_v53, %v8708_v9  ;;  %v3635_v60 = vmul.f32 2.0, %v3634_v59 }
0x27f8   :  { %6433 = vmatmul.mubr.msk.f32.vlgmr.msra.gmra.mrb[44].mxu0 %vm78_vm1, %v3488_v54  ;;  %v3636_v63 = vadd.f32 %v3635_v60, %v8745_v25  ;;  %v4251_v60 = vcombine.low %v8122_v31, %v8410_v18 }
0x27f9   :  { %7528 = vmatpush3.bf16.msra.mxu0 %v7909_v17  ;;  %6467 = vmatprep.mubr.msk.f32.mxu0 %vm7803_vm0, %v7804_v6 }
0x27fa   :  { %7529 = vmatprep.subr.bf16.mxu0 %v7802_v3 }
0x27fd   :  { %7531 = vmatpush3.bf16.msra.mxu0 %v7923_v20 }
0x27fe   :  { %7532 = vmatprep.subr.bf16.mxu0 %v7802_v3 }
0x2801   :  { %7534 = vmatpush3.bf16.msra.mxu0 %v7935_v23 }
0x2802   :  { %7535 = vmatprep.subr.bf16.mxu0 %v7802_v3 }
0x2805   :  { %7537 = vmatpush3.bf16.msra.mxu0 %v7945_v26 }
0x2806   :  { %7538 = vmatprep.subr.bf16.mxu0 %v7802_v3 }
0x2809   :  { %7540 = vmatpush3.bf16.msra.mxu0 %v7955_v29 }
0x280a   :  { %7541 = vmatprep.subr.bf16.mxu0 %v7802_v3 }
0x280d   :  { %7543 = vmatpush3.bf16.msra.mxu0 %v7966_v32 }
0x280e   :  { %7544 = vmatprep.subr.bf16.mxu0 %v7802_v3 }
0x2811   :  { %7546 = vmatpush3.bf16.msra.mxu0 %v7976_v35 }
0x2812   :  { %7547 = vmatprep.subr.bf16.mxu0 %v7802_v3 }
0x2815   :  { %7549 = vmatpush3.bf16.msra.mxu0 %v7985_v38 }
0x2816   :  { %7586 = vmatprep.subr.bf16.mxu0 %v7802_v3 }
0x28cb   :  { %v3558_v55 = vpop.f32.mrb[44].mxu0 }
0x28cc   :  { %v3559_v56 = vadd.f32 %v8473_v34, %v3558_v55  ;;  %v6434_v57 = vpop.f32.mrb[45].mxu0  ;;  %v4241_v55 = vshrl.u32 %v4240_v52, 7 }
0x28cd   :  { %v4252_v57 = vcombine.high %v8122_v31, %v8410_v18 }
0x28ce   :  { %7748 = vtanh.f32 %v3559_v56 }
0x28d8   :  { %v7749_v58 = vpop.eup %7748 }
0x28d9   :  { %6468 = vmatmul.mubr.f32.vlgmr.msra.gmra.mrb[46].mxu0 %v7749_v58  ;;  %v7806_v58 = vmov 1934713408  }
0x28da   :  { %7588 = vmatpush3.bf16.msra.mxu0 %v7857_v4  ;;  %6540 = vmatprep.mubr.msk.f32.mxu0 %vm7803_vm0, %v7804_v6  ;;  %v4302_v59 = vunpack.c.l.s4 %v7806_v58 }
0x28db   :  { %7589 = vmatprep.subr.bf16.mxu0 %v7802_v3 }
0x28de   :  { %7591 = vmatpush3.bf16.msra.mxu0 %v7868_v7 }
0x28df   :  { %7592 = vmatprep.subr.bf16.mxu0 %v7802_v3 }
0x28e2   :  { %7594 = vmatpush3.bf16.msra.mxu0 %v7880_v10 }
0x28e3   :  { %7595 = vmatprep.subr.bf16.mxu0 %v7802_v3 }
0x28e6   :  { %7597 = vmatpush3.bf16.msra.mxu0 %v7892_v13 }
0x28e7   :  { %7598 = vmatprep.subr.bf16.mxu0 %v7802_v3 }
0x29ac   :  { %v3629_v61 = vpop.f32.mrb[46].mxu0 }
0x29ad   :  { %v3630_v62 = vadd.f32 %v8489_v42, %v3629_v61  ;;  %v6469_v0 = vpop.f32.mrb[47].mxu0 }
0x29af   :  { %v3637_v2 = vadd.f32 %v3636_v63, %v3630_v62  ;;  %v7762_v62 = vld [vmem:[%s9004_s1] sm:$0xff]  ;;  %s7807_s1 = smov 64  }
0x29b0   :  { %v4236_v63 = vcombine.high %v7762_v62, %v8266_v24 }
0x29b1   :  { %v3639_v5 = vmul.f32 %v3638_v1, %v3637_v2  ;;  %v4235_v1 = vcombine.low %v7762_v62, %v8266_v24 }
0x29b3   :  { %v8852_v8 = vadd.f32 %v3639_v5, %v8708_v9 }
0x29b5   :  { %6487 = vmatmul.mubr.msk.f32.vlgmr.msra.gmra.mrb[48].mxu1 %vm78_vm1, %v8852_v8  ;;  %v4267_v31 = vcombine.low %v8564_v12, %v8852_v8 }
0x29b6   :  { %7564 = vmatpush3.bf16.msra.mxu1 %v7909_v17  ;;  %6521 = vmatprep.mubr.msk.f32.mxu1 %vm7803_vm0, %v7804_v6 }
0x29b7   :  { %7565 = vmatprep.subr.bf16.mxu1 %v7802_v3 }
0x29ba   :  { %7567 = vmatpush3.bf16.msra.mxu1 %v7923_v20 }
0x29bb   :  { %7568 = vmatprep.subr.bf16.mxu1 %v7802_v3 }
0x29be   :  { %7570 = vmatpush3.bf16.msra.mxu1 %v7935_v23 }
0x29bf   :  { %7571 = vmatprep.subr.bf16.mxu1 %v7802_v3 }
0x29c2   :  { %7573 = vmatpush3.bf16.msra.mxu1 %v7945_v26 }
0x29c3   :  { %7574 = vmatprep.subr.bf16.mxu1 %v7802_v3 }
0x29c6   :  { %7576 = vmatpush3.bf16.msra.mxu1 %v7955_v29 }
0x29c7   :  { %7577 = vmatprep.subr.bf16.mxu1 %v7802_v3 }
0x29ca   :  { %7579 = vmatpush3.bf16.msra.mxu1 %v7966_v32 }
0x29cb   :  { %7580 = vmatprep.subr.bf16.mxu1 %v7802_v3 }
0x29ce   :  { %7582 = vmatpush3.bf16.msra.mxu1 %v7976_v35 }
0x29cf   :  { %7583 = vmatprep.subr.bf16.mxu1 %v7802_v3 }
0x29d2   :  { %7585 = vmatpush3.bf16.msra.mxu1 %v7985_v38 }
0x29d3   :  { %7622 = vmatprep.subr.bf16.mxu1 %v7802_v3 }
0x2a88   :  { %v3712_v11 = vpop.f32.mrb[48].mxu1 }
0x2a89   :  { %v3713_v14 = vadd.f32 %v8473_v34, %v3712_v11  ;;  %v6488_v15 = vpop.f32.mrb[49].mxu1  ;;  %v4303_v11 = vunpack.c.0.s8 %v4302_v59 }
0x2a8b   :  { %7750 = vtanh.f32 %v3713_v14 }
0x2a95   :  { %v7751_v19 = vpop.eup %7750 }
0x2a96   :  { %6522 = vmatmul.mubr.f32.vlgmr.msra.gmra.mrb[50].mxu1 %v7751_v19  ;;  %v4268_v19 = vcombine.high %v8564_v12, %v8852_v8 }
0x2a97   :  { %7624 = vmatpush3.bf16.msra.mxu1 %v7857_v4  ;;  %6594 = vmatprep.mubr.msk.f32.mxu1 %vm7803_vm0, %v7804_v6 }
0x2a98   :  { %7625 = vmatprep.subr.bf16.mxu1 %v7802_v3 }
0x2a9b   :  { %7627 = vmatpush3.bf16.msra.mxu1 %v7868_v7 }
0x2a9c   :  { %7628 = vmatprep.subr.bf16.mxu1 %v7802_v3 }
0x2a9f   :  { %7630 = vmatpush3.bf16.msra.mxu1 %v7880_v10 }
0x2aa0   :  { %7631 = vmatprep.subr.bf16.mxu1 %v7802_v3 }
0x2aa3   :  { %7633 = vmatpush3.bf16.msra.mxu1 %v7892_v13 }
0x2aa4   :  { %7634 = vmatprep.subr.bf16.mxu1 %v7802_v3 }
0x2b69   :  { %v3783_v21 = vpop.f32.mrb[50].mxu1 }
0x2b6a   :  { %v8889_v25 = vadd.f32 %v8489_v42, %v3783_v21  ;;  %v6523_v39 = vpop.f32.mrb[51].mxu1 }
0x2b6b   :  { %v4306_v39 = vsub.s32 %v4303_v11, %v4241_v55 }
0x2b6c   :  { %v3788_v27 = vmul.f32 %v3787_v22, %v8889_v25 }
0x2b6e   :  { %v3789_v28 = vadd.f32 %v3788_v27, %v8852_v8 }
0x2b70   :  { %6541 = vmatmul.mubr.msk.f32.vlgmr.msra.gmra.mrb[48].mxu0 %vm78_vm1, %v3789_v28 }
0x2b71   :  { %7600 = vmatpush3.bf16.msra.mxu0 %v7909_v17  ;;  %6575 = vmatprep.mubr.msk.f32.mxu0 %vm7803_vm0, %v7804_v6 }
0x2b72   :  { %7601 = vmatprep.subr.bf16.mxu0 %v7802_v3 }
0x2b75   :  { %7603 = vmatpush3.bf16.msra.mxu0 %v7923_v20 }
0x2b76   :  { %7604 = vmatprep.subr.bf16.mxu0 %v7802_v3 }
0x2b79   :  { %7606 = vmatpush3.bf16.msra.mxu0 %v7935_v23 }
0x2b7a   :  { %7607 = vmatprep.subr.bf16.mxu0 %v7802_v3 }
0x2b7d   :  { %7609 = vmatpush3.bf16.msra.mxu0 %v7945_v26 }
0x2b7e   :  { %7610 = vmatprep.subr.bf16.mxu0 %v7802_v3 }
0x2b81   :  { %7612 = vmatpush3.bf16.msra.mxu0 %v7955_v29 }
0x2b82   :  { %7613 = vmatprep.subr.bf16.mxu0 %v7802_v3 }
0x2b85   :  { %7615 = vmatpush3.bf16.msra.mxu0 %v7966_v32 }
0x2b86   :  { %7616 = vmatprep.subr.bf16.mxu0 %v7802_v3 }
0x2b89   :  { %7618 = vmatpush3.bf16.msra.mxu0 %v7976_v35 }
0x2b8a   :  { %7619 = vmatprep.subr.bf16.mxu0 %v7802_v3 }
0x2b8d   :  { %7621 = vmatpush3.bf16.msra.mxu0 %v7985_v38 }
0x2b8e   :  { %7658 = vmatprep.subr.bf16.mxu0 %v7802_v3 }
0x2c43   :  { %v3859_v30 = vpop.f32.mrb[48].mxu0 }
0x2c44   :  { %v3860_v16 = vadd.f32 %v8473_v34, %v3859_v30  ;;  %v6542_v33 = vpop.f32.mrb[49].mxu0 }
0x2c46   :  { %7752 = vtanh.f32 %v3860_v16 }
0x2c50   :  { %v7753_v44 = vpop.eup %7752 }
0x2c51   :  { %6576 = vmatmul.mubr.f32.vlgmr.msra.gmra.mrb[50].mxu0 %v7753_v44 }
0x2c52   :  { %7660 = vmatpush3.bf16.msra.mxu0 %v7857_v4  ;;  %6648 = vmatprep.mubr.msk.f32.mxu0 %vm7803_vm0, %v7804_v6 }
0x2c53   :  { %7661 = vmatprep.subr.bf16.mxu0 %v7802_v3 }
0x2c56   :  { %7663 = vmatpush3.bf16.msra.mxu0 %v7868_v7 }
0x2c57   :  { %7664 = vmatprep.subr.bf16.mxu0 %v7802_v3 }
0x2c5a   :  { %7666 = vmatpush3.bf16.msra.mxu0 %v7880_v10  ;;  %v7760_v10 = vld [vmem:[%s9006_s3] ss:$0 sm:$0xff]  ;;  %s4227_s3 = smul.f32 0.16666667, %s8885_s23 }
0x2c5b   :  { %7667 = vmatprep.subr.bf16.mxu0 %v7802_v3 }
0x2c5e   :  { %7669 = vmatpush3.bf16.msra.mxu0 %v7892_v13 }
0x2c5f   :  { %7670 = vmatprep.subr.bf16.mxu0 %v7802_v3 }
0x2d24   :  { %v3930_v34 = vpop.f32.mrb[50].mxu0 }
0x2d25   :  { %v3931_v4 = vadd.f32 %v8489_v42, %v3930_v34  ;;  %v6577_v36 = vpop.f32.mrb[51].mxu0 }
0x2d27   :  { %v3934_v37 = vmul.f32 %v3931_v4, %v3787_v22 }
0x2d29   :  { %v3935_v40 = vadd.f32 %v3934_v37, %v8852_v8 }
0x2d2b   :  { %6595 = vmatmul.mubr.msk.f32.vlgmr.msra.gmra.mrb[52].mxu1 %vm78_vm1, %v3935_v40 }
0x2d2c   :  { %7636 = vmatpush3.bf16.msra.mxu1 %v7909_v17  ;;  %6629 = vmatprep.mubr.msk.f32.mxu1 %vm7803_vm0, %v7804_v6 }
0x2d2d   :  { %7637 = vmatprep.subr.bf16.mxu1 %v7802_v3 }
0x2d30   :  { %7639 = vmatpush3.bf16.msra.mxu1 %v7923_v20 }
0x2d31   :  { %7640 = vmatprep.subr.bf16.mxu1 %v7802_v3 }
0x2d34   :  { %7642 = vmatpush3.bf16.msra.mxu1 %v7935_v23 }
0x2d35   :  { %7643 = vmatprep.subr.bf16.mxu1 %v7802_v3 }
0x2d38   :  { %7645 = vmatpush3.bf16.msra.mxu1 %v7945_v26 }
0x2d39   :  { %7646 = vmatprep.subr.bf16.mxu1 %v7802_v3 }
0x2d3c   :  { %7648 = vmatpush3.bf16.msra.mxu1 %v7955_v29 }
0x2d3d   :  { %7649 = vmatprep.subr.bf16.mxu1 %v7802_v3 }
0x2d40   :  { %7651 = vmatpush3.bf16.msra.mxu1 %v7966_v32 }
0x2d41   :  { %7652 = vmatprep.subr.bf16.mxu1 %v7802_v3 }
0x2d44   :  { %7654 = vmatpush3.bf16.msra.mxu1 %v7976_v35 }
0x2d45   :  { %7655 = vmatprep.subr.bf16.mxu1 %v7802_v3 }
0x2d48   :  { %7657 = vmatpush3.bf16.msra.mxu1 %v7985_v38 }
0x2dfe   :  { %v4005_v7 = vpop.f32.mrb[52].mxu1 }
0x2dff   :  { %v4006_v13 = vadd.f32 %v7760_v10, %v4005_v7  ;;  %v6596_v42 = vpop.f32.mrb[53].mxu1 }
0x2e01   :  { %7754 = vtanh.f32 %v4006_v13 }
0x2e0b   :  { %v7755_v41 = vpop.eup %7754 }
0x2e0c   :  { %6630 = vmatmul.mubr.f32.vlgmr.msra.gmra.mrb[54].mxu1 %v7755_v41 }
0x2edf   :  { %v4076_v43 = vpop.f32.mrb[54].mxu1 }
0x2ee0   :  { %v4077_v47 = vadd.f32 %v7761_v46, %v4076_v43  ;;  %v6631_v48 = vpop.f32.mrb[55].mxu1 }
0x2ee2   :  { %v4081_v49 = vmul.f32 %v4080_v45, %v4077_v47 }
0x2ee4   :  { %v4082_v50 = vadd.f32 %v4081_v49, %v8852_v8 }
0x2ee6   :  { %6649 = vmatmul.mubr.msk.f32.vlgmr.msra.gmra.mrb[52].mxu0 %vm78_vm1, %v4082_v50 }
0x2ee7   :  { %7672 = vmatpush3.bf16.msra.mxu0 %v7909_v17  ;;  %6683 = vmatprep.mubr.msk.f32.mxu0 %vm7803_vm0, %v7804_v6 }
0x2ee8   :  { %7673 = vmatprep.subr.bf16.mxu0 %v7802_v3 }
0x2eeb   :  { %7675 = vmatpush3.bf16.msra.mxu0 %v7923_v20 }
0x2eec   :  { %7676 = vmatprep.subr.bf16.mxu0 %v7802_v3 }
0x2eef   :  { %7678 = vmatpush3.bf16.msra.mxu0 %v7935_v23 }
0x2ef0   :  { %7679 = vmatprep.subr.bf16.mxu0 %v7802_v3 }
0x2ef3   :  { %7681 = vmatpush3.bf16.msra.mxu0 %v7945_v26  ;;  %v4228_v26 = vadd.f32 %v4077_v47, %v3931_v4 }
0x2ef4   :  { %7682 = vmatprep.subr.bf16.mxu0 %v7802_v3 }
0x2ef7   :  { %7684 = vmatpush3.bf16.msra.mxu0 %v7955_v29  ;;  %v7805_v29 = vmov 1983009808  }
0x2ef8   :  { %7685 = vmatprep.subr.bf16.mxu0 %v7802_v3  ;;  %v4238_v51 = vunpack.c.l.s4 %v7805_v29 }
0x2efa   :  { %v4239_v54 = vunpack.c.0.s8 %v4238_v51 }
0x2efb   :  { %7687 = vmatpush3.bf16.msra.mxu0 %v7966_v32  ;;  %v4229_v32 = vmul.f32 2.0, %v4228_v26 }
0x2efc   :  { %7688 = vmatprep.subr.bf16.mxu0 %v7802_v3  ;;  %v4242_v0 = vsub.s32 %v4239_v54, %v4241_v55 }
0x2efe   :  { %v4266_v5 = vrot.slane %v4252_v57, %v4242_v0  ;;  %v4259_v14 = vrot.slane %v4251_v60, %v4242_v0  ;;  %v4250_v18 = vrot.slane %v4236_v63, %v4242_v0  ;;  %v4243_v21 = vrot.slane %v4235_v1, %v4242_v0 }
0x2eff   :  { %7690 = vmatpush3.bf16.msra.mxu0 %v7976_v35  ;;  %v4282_v28 = vrot.slane %v4268_v19, %v4242_v0  ;;  %v4275_v16 = vrot.slane %v4267_v31, %v4242_v0 }
0x2f00   :  { %7691 = vmatprep.subr.bf16.mxu0 %v7802_v3  ;;  %v4230_v3 = vadd.f32 %v4229_v32, %v8889_v25  ;;  %v4315_v24 = vcombine.low %v4250_v18, %v4266_v5  ;;  %v4299_v27 = vcombine.low %v4243_v21, %v4259_v14  ;;  %v4316_v44 = vcombine.high %v4250_v18, %v4266_v5 }
0x2f01   :  { %v4300_v34 = vcombine.high %v4243_v21, %v4259_v14 }
0x2f02   :  { %v4323_v12 = vrot.slane %v4315_v24, %v4306_v39 }
0x2f03   :  { %7693 = vmatpush3.bf16.msra.mxu0 %v7985_v38  ;;  %v4232_v38 = vstv %s4227_s3  ;;  %v4314_v41 = vrot.slane %v4300_v34, %v4306_v39 }
0x2fb9   :  { %v4152_v6 = vpop.f32.mrb[52].mxu0 }
0x2fba   :  { %v4153_v17 = vadd.f32 %v7760_v10, %v4152_v6  ;;  %v6650_v20 = vpop.f32.mrb[53].mxu0 }
0x2fbc   :  { %7756 = vtanh.f32 %v4153_v17 }
0x2fc6   :  { %v7757_v23 = vpop.eup %7756 }
0x2fc7   :  { %6684 = vmatmul.mubr.f32.vlgmr.msra.gmra.mrb[54].mxu0 %v7757_v23 }
0x309a   :  { %v4223_v53 = vpop.f32.mrb[54].mxu0 }
0x309b   :  { %v4224_v35 = vadd.f32 %v7761_v46, %v4223_v53  ;;  %v6685_v56 = vpop.f32.mrb[55].mxu0 }
0x309d   :  { %v4231_v61 = vadd.f32 %v4230_v3, %v4224_v35 }
0x309f   :  { %v4233_v2 = vmul.f32 %v4232_v38, %v4231_v61 }
0x30a1   :  { %v4234_v15 = vadd.f32 %v4233_v2, %v8852_v8  ;;  %v4307_v8 = vrot.slane %v4299_v27, %v4306_v39 }
0x30a3   :  { %v4283_v22 = vcombine.low %v8708_v9, %v4234_v15  ;;  %v4284_v25 = vcombine.high %v8708_v9, %v4234_v15  ;;  %v4330_v9 = vrot.slane %v4316_v44, %v4306_v39 }
0x30a5   :  { %v4298_v30 = vrot.slane %v4284_v25, %v4242_v0  ;;  %v4291_v33 = vrot.slane %v4283_v22, %v4242_v0 }
0x30a7   :  { %v4347_v4 = vcombine.low %v4282_v28, %v4298_v30  ;;  %v4331_v36 = vcombine.low %v4275_v16, %v4291_v33  ;;  %v4348_v37 = vcombine.high %v4282_v28, %v4298_v30  ;;  %v4332_v40 = vcombine.high %v4275_v16, %v4291_v33 }
0x30a9   :  { %v4355_v7 = vrot.slane %v4347_v4, %v4306_v39  ;;  %v4339_v10 = vrot.slane %v4331_v36, %v4306_v39  ;;  %v4362_v13 = vrot.slane %v4348_v37, %v4306_v39  ;;  %v4346_v42 = vrot.slane %v4332_v40, %v4306_v39 }
0x30ab   :  { %v4368_v43 = vcombine.high %v4323_v12, %v4355_v7  ;;  %v4367_v45 = vcombine.low %v4323_v12, %v4355_v7  ;;  %v4364_v46 = vcombine.high %v4307_v8, %v4339_v10  ;;  %v4363_v47 = vcombine.low %v4307_v8, %v4339_v10 }
0x30ac   :  { %v4369_v48 = vcombine.low %v4330_v9, %v4362_v13  ;;  %v4365_v49 = vcombine.low %v4314_v41, %v4346_v42  ;;  %v4370_v50 = vcombine.high %v4330_v9, %v4362_v13  ;;  %v4366_v6 = vcombine.high %v4314_v41, %v4346_v42 }
0x30ad   :  { %4380 = vrot.lane.b32.xlu1 %v4368_v43, %s7807_s1  ;;  %4372 = vrot.lane.b32.xlu0 %v4364_v46, %s7807_s1 }
0x30b1   :  { %4384 = vrot.lane.b32.xlu1 %v4370_v50, %s7807_s1  ;;  %4376 = vrot.lane.b32.xlu0 %v4366_v6, %s7807_s1 }
0x311f   :  { %v4381_v17 = vpop.permute.xlu1 %4380  ;;  %v4373_v20 = vpop.permute.xlu0 %4372 }
0x3120   :  { %v4389_v23 = vsel %vm78_vm1, %v4367_v45, %v4381_v17  ;;  %v4387_v26 = vsel %vm78_vm1, %v4363_v47, %v4373_v20 }
0x3121   :  { %4393 = vst [vmem:[#allocation5 + $0x10] sm:$0xff] %v4389_v23  ;;  %4391 = vst [vmem:[#allocation5] sm:$0xff] %v4387_v26 }
0x3123   :  { %v4385_v29 = vpop.permute.xlu1 %4384  ;;  %v4377_v51 = vpop.permute.xlu0 %4376 }
0x3124   :  { %v4390_v52 = vsel %vm78_vm1, %v4369_v48, %v4385_v29  ;;  %v4388_v32 = vsel %vm78_vm1, %v4365_v49, %v4377_v51 }
0x3125   :  { %4394 = vst [vmem:[#allocation5 + $0x18] sm:$0xff] %v4390_v52  ;;  %4392 = vst [vmem:[#allocation5 + $0x8] sm:$0xff] %v4388_v32 }
0x3126   :  { %7786 = shalt.err (!%p7783_p9)
}
0x3127   :  { %s7787_s9 = scalar_lea.hbm %s9009_s6, 512 }
0x3128   :  { %p7788_p10 = scmp.ne.s32.totalorder %s9009_s6, %s7787_s9  ;;  %p7791_p11 = scmp.lt.u32.totalorder %s7787_s9, %s9009_s6 }
0x312a   :  { %p7793_p12 = pnand %p7791_p11, %p7788_p10 }
0x312c   :  { %7796 = shalt.err (!%p7793_p12)
}
0x312d   :  { %4404 = dma.vmem_to_hbm [thread:$0]  %s4402_s0, 512, %s9009_s6, [#allocation3]  }
0x312e   :  { %7799 = dma.done.wait [#allocation3], 512  }
0x312f   :  { %7800 = vsyncadd [#allocation3], 4294966784 }
0x3130   :  { %4408 = vsyncpa [#allocation3], 1 }
0x3131   :  { %4409 = vsyncpa [#allocation4], 1 }

</bundles_post_ra>
